<compile_context>
chip_gen: v7x
topology: tpu7x:2x2x1
jax: 0.10.0
libtpu: 0.0.40
codegen_flags: <defaults>
</compile_context>

<pallas_src>
import functools
import math

import jax
import jax.numpy as jnp
from jax import lax
from jax.experimental import pallas as pl
from jax.experimental.pallas import tpu as pltpu

EPS = 1e-5
LANE = 128
SUB = 8
MAX_TILE_K = 1536


def _round_up(x, m):
    return (x + m - 1) // m * m


def _hw_limits():
    """(VMEM compute budget bytes, row-tile cap).  v7x has half the VMEM."""
    try:
        info = pltpu.get_tpu_info()
        small = info.vmem_capacity_bytes <= 64 * 1024 * 1024
    except Exception:
        small = True
    return ((20 if small else 24) * 1024 * 1024, 512 if small else 1024)


def _choose_tiles(M, K, Cout):
    """Lane-dense, VMEM-aware, balanced (M, K) tiling for the matmul pass."""
    c_pad = _round_up(max(Cout, LANE), LANE)
    k_pad = _round_up(K, LANE)
    if k_pad <= MAX_TILE_K:
        tile_k, n_kt = k_pad, 1
    else:
        n_kt = pl.cdiv(k_pad, MAX_TILE_K)
        tile_k = _round_up(pl.cdiv(k_pad, n_kt), LANE)   # balanced, no 128-tile fallback
        n_kt = pl.cdiv(k_pad, tile_k)
    k_full = n_kt * tile_k

    budget, cap = _hw_limits()
    # Double-buffered weights/stats tiles + (patches-in + resident f32 out) per row.
    fixed = tile_k * c_pad * 2 * 2 + SUB * c_pad * 4 * 2
    per_row = tile_k * 2 * 2 + c_pad * 4 * 2
    vmem_rows = max(SUB, (budget - fixed) // per_row // SUB * SUB)
    m8 = _round_up(M, SUB)
    tile_m = min(cap, vmem_rows, m8)
    n_mt = pl.cdiv(m8, tile_m)
    tile_m = _round_up(pl.cdiv(m8, n_mt), SUB)           # re-balance row tiles
    n_mt = pl.cdiv(m8, tile_m)
    m_full = n_mt * tile_m
    return tile_m, n_mt, m_full, tile_k, n_kt, k_full, c_pad


# ----------------------------------------------------------------------------
# Pass 1: tiled im2col matmul (bf16 MXU, f32 accumulate) + BN partial stats.
# The f32 output block is resident across the K axis and used as accumulator.
# ----------------------------------------------------------------------------
def _matmul_stats_kernel(p_ref, w_ref, y_ref, stats_ref):
    k = pl.program_id(1)
    prod = jnp.dot(p_ref[...], w_ref[...], preferred_element_type=jnp.float32)

    @pl.when(k == 0)
    def _first():
        y_ref[...] = prod

    @pl.when(k > 0)
    def _accumulate():
        y_ref[...] += prod

    @pl.when(k == pl.num_programs(1) - 1)
    def _finalize():
        y = y_ref[...]
        # Per-row-tile partial statistics (padded rows/channels are exact zeros
        # so they do not perturb the sums).  Row 0 = sum, row 1 = sum of squares.
        s1 = jnp.sum(y, axis=0, keepdims=True)
        s2 = jnp.sum(y * y, axis=0, keepdims=True)
        stats_ref[...] = jnp.concatenate(
            [s1, s2, jnp.zeros((SUB - 2, y.shape[1]), jnp.float32)], axis=0)


# ----------------------------------------------------------------------------
# Pass 2: folded BN affine (one FMA) + optional residual + optional ReLU.
# ----------------------------------------------------------------------------
def _bn_act_kernel(y_ref, scale_ref, shift_ref, out_ref, *, relu):
    y = y_ref[...] * scale_ref[...] + shift_ref[...]
    if relu:
        y = jnp.maximum(y, 0.0)
    out_ref[...] = y.astype(out_ref.dtype)


def _bn_add_act_kernel(y_ref, scale_ref, shift_ref, res_ref, out_ref, *, relu):
    y = y_ref[...] * scale_ref[...] + shift_ref[...] + res_ref[...]
    if relu:
        y = jnp.maximum(y, 0.0)
    out_ref[...] = y.astype(out_ref.dtype)


def conv_bn_act(x_nhwc, weight_oihw, gamma, beta, *, stride=1, padding=1,
                dilation=1, relu=True, residual=None):
    """Fused Conv2d(bias=False) + BatchNorm2d (batch stats) [+ residual] [+ ReLU].

    x_nhwc: (N, H, W, Cin) f32.  weight_oihw: (Cout, Cin, KH, KW) (PyTorch OIHW).
    residual: optional (N, OH, OW, Cout), added after the BN affine, before ReLU.
    Returns (N, OH, OW, Cout) f32.
    """
    N, H, W, Cin = x_nhwc.shape
    Cout, _, KH, KW = weight_oihw.shape
    OH = (H + 2 * padding - dilation * (KH - 1) - 1) // stride + 1
    OW = (W + 2 * padding - dilation * (KW - 1) - 1) // stride + 1
    M = N * OH * OW
    K = KH * KW * Cin

    # -------- im2col glue (plain JAX) ----------------------------------------
    # TODO(synk): replace with a direct-conv kernel (halo DMA + KH*KW shifted
    # matmuls into the resident accumulator) to avoid the KH*KW x HBM expansion.
    xp = jnp.pad(x_nhwc, ((0, 0), (padding, padding), (padding, padding), (0, 0)))
    cols = []
    for kh in range(KH):
        for kw in range(KW):
            h0, w0 = kh * dilation, kw * dilation
            cols.append(xp[:, h0:h0 + stride * (OH - 1) + 1:stride,
                            w0:w0 + stride * (OW - 1) + 1:stride, :])
    patches = jnp.concatenate(cols, axis=-1).reshape(M, K).astype(jnp.bfloat16)
    w_mat = jnp.transpose(weight_oihw, (2, 3, 1, 0)).reshape(K, Cout)
    w_mat = w_mat.astype(jnp.bfloat16)

    # -------- padding: lane-dense channels, (8,128)-friendly tiles ------------
    tile_m, n_mt, m_full, tile_k, n_kt, k_full, c_pad = _choose_tiles(M, K, Cout)
    patches_p = jnp.pad(patches, ((0, m_full - M), (0, k_full - K)))
    w_p = jnp.pad(w_mat, ((0, k_full - K), (0, c_pad - Cout)))

    flops = 2 * m_full * k_full * c_pad
    bytes_acc = patches_p.size * 2 + w_p.size * 2 + m_full * c_pad * 4
    cparams = pltpu.CompilerParams(
        dimension_semantics=("parallel", "arbitrary"),
        vmem_limit_bytes=32 * 1024 * 1024)

    y_flat, part_stats = pl.pallas_call(
        _matmul_stats_kernel,
        out_shape=(jax.ShapeDtypeStruct((m_full, c_pad), jnp.float32),
                   jax.ShapeDtypeStruct((n_mt * SUB, c_pad), jnp.float32)),
        grid_spec=pltpu.PrefetchScalarGridSpec(
            num_scalar_prefetch=0,
            grid=(n_mt, n_kt),
            in_specs=[
                pl.BlockSpec((tile_m, tile_k), lambda i, k: (i, k)),
                pl.BlockSpec((tile_k, c_pad), lambda i, k: (k, 0)),
            ],
            out_specs=[
                pl.BlockSpec((tile_m, c_pad), lambda i, k: (i, 0)),
                pl.BlockSpec((SUB, c_pad), lambda i, k: (i, 0)),
            ]),
        compiler_params=cparams,
        cost_estimate=pl.CostEstimate(flops=flops, transcendentals=0,
                                      bytes_accessed=bytes_acc),
    )(patches_p, w_p)

    # -------- per-channel batch stats -> folded scale/shift (tiny, JAX) -------
    part = part_stats.reshape(n_mt, SUB, c_pad)
    count = jnp.float32(M)                                # real rows only
    mean = jnp.sum(part[:, 0, :], axis=0) / count
    var = jnp.maximum(jnp.sum(part[:, 1, :], axis=0) / count - mean * mean, 0.0)
    gamma_p = jnp.pad(gamma.astype(jnp.float32), (0, c_pad - Cout))
    beta_p = jnp.pad(beta.astype(jnp.float32), (0, c_pad - Cout))
    scale = gamma_p * lax.rsqrt(var + EPS)
    shift = beta_p - mean * scale
    scale_row = scale.reshape(1, c_pad)
    shift_row = shift.reshape(1, c_pad)

    # -------- pass 2: normalize (+ residual) (+ ReLU) --------------------------
    row_spec = pl.BlockSpec((tile_m, c_pad), lambda i: (i, 0))
    chan_spec = pl.BlockSpec((1, c_pad), lambda i: (0, 0))
    cparams2 = pltpu.CompilerParams(dimension_semantics=("parallel",),
                                    vmem_limit_bytes=32 * 1024 * 1024)
    out_sds = jax.ShapeDtypeStruct((m_full, c_pad), jnp.float32)

    if residual is None:
        bytes2 = 3 * m_full * c_pad * 4
        out_flat = pl.pallas_call(
            functools.partial(_bn_act_kernel, relu=relu),
            out_shape=out_sds,
            grid_spec=pltpu.PrefetchScalarGridSpec(
                num_scalar_prefetch=0, grid=(n_mt,),
                in_specs=[row_spec, chan_spec, chan_spec],
                out_specs=row_spec),
            compiler_params=cparams2,
            cost_estimate=pl.CostEstimate(flops=2 * m_full * c_pad,
                                          transcendentals=0,
                                          bytes_accessed=bytes2),
        )(y_flat, scale_row, shift_row)
    else:
        res_p = jnp.pad(residual.astype(jnp.float32).reshape(M, Cout),
                        ((0, m_full - M), (0, c_pad - Cout)))
        bytes2 = 4 * m_full * c_pad * 4
        out_flat = pl.pallas_call(
            functools.partial(_bn_add_act_kernel, relu=relu),
            out_shape=out_sds,
            grid_spec=pltpu.PrefetchScalarGridSpec(
                num_scalar_prefetch=0, grid=(n_mt,),
                in_specs=[row_spec, chan_spec, chan_spec, row_spec],
                out_specs=row_spec),
            compiler_params=cparams2,
            cost_estimate=pl.CostEstimate(flops=3 * m_full * c_pad,
                                          transcendentals=0,
                                          bytes_accessed=bytes2),
        )(y_flat, scale_row, shift_row, res_p)

    return out_flat[:M, :Cout].reshape(N, OH, OW, Cout)


# ----------------------------------------------------------------------------
# ResNet (BasicBlock) assembly.
# ----------------------------------------------------------------------------
def maxpool_3x3_s2_nhwc(x):
    # TODO(synk): maxpool left as plain-JAX window reduce (bandwidth-trivial glue).
    return lax.reduce_window(x, -jnp.inf, lax.max,
                             (1, 3, 3, 1), (1, 2, 2, 1),
                             ((0, 0), (1, 1), (1, 1), (0, 0)))


def _conv_bn_params(key, cin, cout, ksize):
    n = ksize * ksize * cout
    w = jax.random.normal(key, (cout, cin, ksize, ksize), jnp.float32) * math.sqrt(2.0 / n)
    return {"w": w,
            "gamma": jnp.ones((cout,), jnp.float32),   # BatchNorm2d weight init
            "beta": jnp.zeros((cout,), jnp.float32)}   # BatchNorm2d bias init


def make_resnet_params(key, layers=(1, 1, 1, 1), in_channels=3):
    keys = iter(jax.random.split(key, 256))
    params = {"conv1": _conv_bn_params(next(keys), in_channels, 64, 7)}
    inplanes = 64
    for li, (planes, blocks, stride) in enumerate(
            zip((64, 128, 256, 512), layers, (1, 2, 2, 2)), start=1):
        layer = []
        for b in range(blocks):
            blk_stride = stride if b == 0 else 1
            blk = {
                "stride": blk_stride,
                "conv1": _conv_bn_params(next(keys), inplanes, planes, 3),
                "conv2": _conv_bn_params(next(keys), planes, planes, 3),
                "conv3": _conv_bn_params(next(keys), planes, planes, 3),
            }
            if blk_stride != 1 or inplanes != planes:      # BasicBlock.expansion == 1
                blk["downsample"] = _conv_bn_params(next(keys), inplanes, planes, 1)
            layer.append(blk)
            inplanes = planes
        params[f"layer{li}"] = layer
    return params


def basic_block_forward(x, blk):
    stride = blk["stride"]
    out = conv_bn_act(x, blk["conv1"]["w"], blk["conv1"]["gamma"], blk["conv1"]["beta"],
                      stride=1, padding=1, relu=True)
    out = conv_bn_act(out, blk["conv2"]["w"], blk["conv2"]["gamma"], blk["conv2"]["beta"],
                      stride=stride, padding=1, relu=True)
    if "downsample" in blk:
        identity = conv_bn_act(x, blk["downsample"]["w"], blk["downsample"]["gamma"],
                               blk["downsample"]["beta"], stride=stride, padding=0,
                               relu=False)
    else:
        identity = x
    # conv3 + bn3 + residual add + final ReLU fused into one normalize kernel.
    out = conv_bn_act(out, blk["conv3"]["w"], blk["conv3"]["gamma"], blk["conv3"]["beta"],
                      stride=1, padding=1, relu=True, residual=identity)
    return out


def resnet_forward(x_nchw, params):
    """Pallas ResNet(BasicBlock) forward; returns (x2, x3, x4, x5) in NCHW."""
    x = jnp.transpose(x_nchw, (0, 2, 3, 1)).astype(jnp.float32)   # NHWC end-to-end
    x = conv_bn_act(x, params["conv1"]["w"], params["conv1"]["gamma"],
                    params["conv1"]["beta"], stride=2, padding=3, relu=True)
    x = maxpool_3x3_s2_nhwc(x)
    feats = []
    for name in ("layer1", "layer2", "layer3", "layer4"):
        for blk in params[name]:
            x = basic_block_forward(x, blk)
        feats.append(jnp.transpose(x, (0, 3, 1, 2)))
    return tuple(feats)


# ----------------------------------------------------------------------------
# Pure-JAX reference (lax conv + batch-stat BN + ReLU), NCHW throughout.
# ----------------------------------------------------------------------------
def _ref_conv_bn_act(x, p, *, stride, padding, relu, residual=None):
    y = lax.conv_general_dilated(
        x, p["w"], (stride, stride), ((padding, padding), (padding, padding)),
        dimension_numbers=("NCHW", "OIHW", "NCHW"))
    mean = jnp.mean(y, axis=(0, 2, 3), keepdims=True)
    var = jnp.mean((y - mean) ** 2, axis=(0, 2, 3), keepdims=True)
    y = (y - mean) * lax.rsqrt(var + EPS)
    y = y * p["gamma"][None, :, None, None] + p["beta"][None, :, None, None]
    if residual is not None:
        y = y + residual
    if relu:
        y = jnp.maximum(y, 0.0)
    return y


def _ref_basic_block(x, blk):
    stride = blk["stride"]
    out = _ref_conv_bn_act(x, blk["conv1"], stride=1, padding=1, relu=True)
    out = _ref_conv_bn_act(out, blk["conv2"], stride=stride, padding=1, relu=True)
    identity = x
    if "downsample" in blk:
        identity = _ref_conv_bn_act(x, blk["downsample"], stride=stride, padding=0,
                                    relu=False)
    return _ref_conv_bn_act(out, blk["conv3"], stride=1, padding=1, relu=True,
                            residual=identity)


def resnet_reference(x_nchw, params):
    y = _ref_conv_bn_act(x_nchw, params["conv1"], stride=2, padding=3, relu=True)
    y = lax.reduce_window(y, -jnp.inf, lax.max, (1, 1, 3, 3), (1, 1, 2, 2),
                          ((0, 0), (0, 0), (1, 1), (1, 1)))
    feats = []
    for name in ("layer1", "layer2", "layer3", "layer4"):
        for blk in params[name]:
            y = _ref_basic_block(y, blk)
        feats.append(y)
    return tuple(feats)


if __name__ == "__main__":
    key = jax.random.PRNGKey(0)
    kp, kx = jax.random.split(key)

    # ResNet(BasicBlock, layers=[1,1,1,1], in_channels=3).  Input spatial must
    # survive the /32 downsample of the backbone, so use 64x64.
    params = make_resnet_params(kp, layers=(1, 1, 1, 1), in_channels=3)
    x = jax.random.normal(kx, (2, 3, 64, 64), dtype=jnp.float32)

    outs = jax.block_until_ready(resnet_forward(x, params))
    refs = jax.block_until_ready(resnet_reference(x, params))

    expected = [(2, 64, 16, 16), (2, 128, 8, 8), (2, 256, 4, 4), (2, 512, 2, 2)]
    for i, (o, r) in enumerate(zip(outs, refs)):
        assert o.shape == expected[i], (i, o.shape)
        max_err = float(jnp.max(jnp.abs(o - r)))
        mean_err = float(jnp.mean(jnp.abs(o - r)))
        # Loose bound: bf16 MXU inputs across a 13-conv-deep path, and late BN
        # layers normalize over few samples (batch-stat BN amplifies tiny diffs).
        assert mean_err < 5e-2 and max_err < 0.75, (i, mean_err, max_err)

    print("KERNEL_OK")
</pallas_src>

<mosaic_0001>
module attributes {stable_mosaic.version = 11 : i64} {
  func.func @_matmul_stats_kernel(%arg0: i32, %arg1: i32, %arg2: memref<512x256xbf16, #tpu.memory_space<vmem>>, %arg3: memref<256x128xbf16, #tpu.memory_space<vmem>>, %arg4: memref<512x128xf32, #tpu.memory_space<vmem>>, %arg5: memref<8x128xf32, #tpu.memory_space<vmem>>) attributes {dimension_semantics = [#tpu.dimension_semantics<parallel>, #tpu.dimension_semantics<arbitrary>], iteration_bounds = array<i64: 4, 1>, scalar_prefetch = 0 : i64, scratch_operands = 0 : i64, tpu.core_type = #tpu.core_type<tc>, window_params = [{transform_indices = @transform_0, window_bounds = array<i64: 512, 256>}, {transform_indices = @transform_1, window_bounds = array<i64: 256, 128>}, {transform_indices = @transform_2, window_bounds = array<i64: 512, 128>}, {transform_indices = @transform_3, window_bounds = array<i64: 8, 128>}]} {
    %c0 = arith.constant 0 : index
    %c0_0 = arith.constant 0 : index
    %0 = vector.load %arg2[%c0, %c0_0] : memref<512x256xbf16, #tpu.memory_space<vmem>>, vector<512x256xbf16>
    %c0_1 = arith.constant 0 : index
    %c0_2 = arith.constant 0 : index
    %1 = vector.load %arg3[%c0_1, %c0_2] : memref<256x128xbf16, #tpu.memory_space<vmem>>, vector<256x128xbf16>
    %cst = arith.constant dense<0.000000e+00> : vector<512x128xf32>
    %2 = tpu.matmul %0, %1, %cst {dimension_numbers = #tpu.dot_dimension_numbers<[1], [0], [0], [1], [0, 0, 1, 1], [], []>} : vector<512x256xbf16>, vector<256x128xbf16>, vector<512x128xf32> -> vector<512x128xf32>
    %c0_i32 = arith.constant 0 : i32
    %3 = arith.cmpi eq, %arg1, %c0_i32 : i32
    %4 = arith.extui %3 : i1 to i32
    %c0_i32_3 = arith.constant 0 : i32
    %5 = arith.cmpi ne, %4, %c0_i32_3 : i32
    scf.if %5 {
      %c0_8 = arith.constant 0 : index
      %c0_9 = arith.constant 0 : index
      %12 = vector.load %arg4[%c0_8, %c0_9] : memref<512x128xf32, #tpu.memory_space<vmem>>, vector<512x128xf32>
      tpu.vector_store %arg4[%c0_8, %c0_9], %2 {strides = array<i32>} : memref<512x128xf32, #tpu.memory_space<vmem>>, vector<512x128xf32>,
    } else {
    }
    %c0_i32_4 = arith.constant 0 : i32
    %6 = arith.cmpi sgt, %arg1, %c0_i32_4 : i32
    %7 = arith.extui %6 : i1 to i32
    %c0_i32_5 = arith.constant 0 : i32
    %8 = arith.cmpi ne, %7, %c0_i32_5 : i32
    scf.if %8 {
      %c0_8 = arith.constant 0 : index
      %c0_9 = arith.constant 0 : index
      %12 = vector.load %arg4[%c0_8, %c0_9] : memref<512x128xf32, #tpu.memory_space<vmem>>, vector<512x128xf32>
      %13 = arith.addf %12, %2 : vector<512x128xf32>
      %c0_10 = arith.constant 0 : index
      %c0_11 = arith.constant 0 : index
      %14 = vector.load %arg4[%c0_10, %c0_11] : memref<512x128xf32, #tpu.memory_space<vmem>>, vector<512x128xf32>
      tpu.vector_store %arg4[%c0_10, %c0_11], %13 {strides = array<i32>} : memref<512x128xf32, #tpu.memory_space<vmem>>, vector<512x128xf32>,
    } else {
    }
    %c0_i32_6 = arith.constant 0 : i32
    %9 = arith.cmpi eq, %arg1, %c0_i32_6 : i32
    %10 = arith.extui %9 : i1 to i32
    %c0_i32_7 = arith.constant 0 : i32
    %11 = arith.cmpi ne, %10, %c0_i32_7 : i32
    scf.if %11 {
      %c0_8 = arith.constant 0 : index
      %c0_9 = arith.constant 0 : index
      %12 = vector.load %arg4[%c0_8, %c0_9] : memref<512x128xf32, #tpu.memory_space<vmem>>, vector<512x128xf32>
      %cst_10 = arith.constant dense<0.000000e+00> : vector<128xf32>
      %13 = vector.multi_reduction <add>, %12, %cst_10 [0] : vector<512x128xf32> to vector<128xf32>
      %14 = vector.shape_cast %13 : vector<128xf32> to vector<1x128xf32>
      %15 = arith.mulf %12, %12 : vector<512x128xf32>
      %cst_11 = arith.constant dense<0.000000e+00> : vector<128xf32>
      %16 = vector.multi_reduction <add>, %15, %cst_11 [0] : vector<512x128xf32> to vector<128xf32>
      %17 = vector.shape_cast %16 : vector<128xf32> to vector<1x128xf32>
      %cst_12 = arith.constant 0.000000e+00 : f32
      %18 = vector.broadcast %cst_12 : f32 to vector<6x128xf32>
      %19 = tpu.concatenate %14, %17, %18 in 0 : vector<1x128xf32>, vector<1x128xf32>, vector<6x128xf32> -> vector<8x128xf32>
      %c0_13 = arith.constant 0 : index
      %c0_14 = arith.constant 0 : index
      %20 = vector.load %arg5[%c0_13, %c0_14] : memref<8x128xf32, #tpu.memory_space<vmem>>, vector<8x128xf32>
      tpu.vector_store %arg5[%c0_13, %c0_14], %19 {strides = array<i32>} : memref<8x128xf32, #tpu.memory_space<vmem>>, vector<8x128xf32>,
    } else {
    }
    return
  }
  func.func @transform_0(%arg0: i32, %arg1: i32) -> (i32, i32) {
    %c0_i32 = arith.constant 0 : i32
    return %arg0, %arg1 : i32, i32
  }
  func.func @transform_1(%arg0: i32, %arg1: i32) -> (i32, i32) {
    %c0_i32 = arith.constant 0 : i32
    %c0_i32_0 = arith.constant 0 : i32
    return %arg1, %c0_i32 : i32, i32
  }
  func.func @transform_2(%arg0: i32, %arg1: i32) -> (i32, i32) {
    %c0_i32 = arith.constant 0 : i32
    %c0_i32_0 = arith.constant 0 : i32
    return %arg0, %c0_i32 : i32, i32
  }
  func.func @transform_3(%arg0: i32, %arg1: i32) -> (i32, i32) {
    %c0_i32 = arith.constant 0 : i32
    %c0_i32_0 = arith.constant 0 : i32
    return %arg0, %c0_i32 : i32, i32
  }
}

</mosaic_0001>

<bundles_post_ra>
// kernel: tpu_custom_call.1
= control target key start
LH: loop header
LB: loop body
LE: loop exit
PB: predicated region body
PF: predicated region fallthrough
CT: control target
= control target key end

     0   :  { %9 = vsyncpa [#allocation3], 0  ;;  %s2860_s0 = inlined_call_operand.hbm [shape: bf16[2048,256], index: 0, kind: input, shape index: {}]   ;;  %s2861_s1 = inlined_call_operand.hbm [shape: bf16[256,128], index: 1, kind: input, shape index: {}]   ;;  %s2862_s2 = inlined_call_operand.hbm [shape: f32[2048,128], index: 2, kind: output, shape index: {0}]   ;;  %s2863_s3 = inlined_call_operand.hbm [shape: f32[32,128], index: 3, kind: output, shape index: {1}]  }
   0x1   :  { %11 = vsyncpa [#allocation3 + $0x1], 0 }
   0x2   :  { %12 = vsyncpa [#allocation6], 0 }
   0x3   :  { %13 = vsyncpa [#allocation4], 0 }
   0x4   :  { %15 = vsyncpa [#allocation4 + $0x1], 0 }
   0x5   :  { %16 = vsyncpa [#allocation9], 0 }
   0x6   :  { %18 = vsyncpa [#allocation9 + $0x1], 0  ;;  %s2286_s12 = smov 0   ;;  %s2288_s13 = smov 0  }
   0x7   :  { %s2290_s14 = smov 0   ;;  %s2292_s15 = smov 0  }
   0x8   :  { %s2294_s16 = smov 0   ;;  %s2296_s17 = smov 0  }
   0x9 LB: > { %s1744_s18 = sadd.s32 4294967295, %s2253_s17   ;;  %s1745_s19 = sadd.s32 4294967294, %s2253_s17   ;;  %s2253_s17 = sphi %s2296_s17, %s24_s17   ;;  %s2249_s16 = sphi %s2294_s16, %s2886_s16   ;;  %s2245_s15 = sphi %s2292_s15, %s2885_s15   ;;  %s2241_s14 = sphi %s2290_s14, %s2884_s14   ;;  %s2237_s13 = sphi %s2288_s13, %s2883_s13   ;;  %s2233_s12 = sphi %s2286_s12, %s2882_s12  }
   0xa   : > { %p58_p0 = scmp.ne.s32.totalorder %s2237_s13, %s2233_s12  ;;  %p2320_p1 = scmp.eq.s32.totalorder %s1744_s18, 0 }
   0xb   : > { %p2324_p2 = scmp.eq.s32.totalorder %s1744_s18, 3  ;;  %p114_p3 = scmp.eq.s32.totalorder %s1745_s19, 3 }
   0xc   : > { %s2868_s20 = scalar_select %p2320_p1, 1, 0 }
   0xd   : > { %s2869_s21 = scalar_select %p2324_p2, 1, 0 }
   0xe   : > { %p2330_p4 = por %p2320_p1, %p58_p0  ;;  %p1746_p5 = scmp.ge.s32.totalorder %s2253_s17, 1 }
   0xf   : > { %p2335_p6 = por %p114_p3, %p58_p0  ;;  %p147_p7 = scmp.lt.s32.totalorder %s2253_s17, 5 }
  0x10   : > { %s2870_s22 = scalar_select %p2330_p4, 1, 0 }
  0x11   : > { %s2871_s23 = scalar_select %p2335_p6, 1, 0 }
  0x12   : > { %p2340_p8 = pnand %p1746_p5, %p147_p7  ;;  %s2255_s25 = smov [#allocation5]  }
  0x13   : > { %s162_s26 = sshll.u32 %s2255_s25, 4  ;;  %s36_s28 = sadd.s32 1, %s2249_s16  ;;  %s163_s26 = int_to_ptr.vmem [resolvable:$true] %s162_s26 }
  0x14   : > { %s2872_s24 = scalar_select %p2340_p8, 1, 0 }
  0x15   : > { %p1890_p9 = pneg %p2340_p8  ;;  %s2077_s4 = scalar_lea.hbm %s2861_s1, 2048 }
  0x16   : > { %p2078_p11 = scmp.ne.s32.totalorder %s2861_s1, %s2077_s4  ;;  %p2084_p3 = scmp.lt.u32.totalorder %s2077_s4, %s2861_s1 }
  0x17   : > { %p2348_p10 = pnand %p1890_p9, %p2320_p1 }
  0x19   : > { %p2079_p12 = pneg %p2348_p10 }
  0x1b   : > { %p2080_p13 = pnand %p2079_p12, %p2078_p11 }
  0x1d   : > { %p2081_p0 = pneg %p2080_p13 }
  0x1f   : > { %p2086_p5 = pnand %p2084_p3, %p2081_p0 }
  0x21   : > { %2089 = shalt.err (!%p2086_p5)
}
  0x22   : > { %s2090_s9 = scalar_lea.vmem %s163_s26, 2048  ;;  %p2098_p1 = scmp.lt.s32.totalorder %s163_s26, %s163_s26 }
  0x23   : > { %p2091_p7 = scmp.ne.s32.totalorder %s163_s26, %s2090_s9  ;;  %p2099_p4 = scmp.lt.s32.totalorder %s2090_s9, %s2090_s9 }
  0x25   : > { %p2093_p9 = pnand %p2091_p7, %p2079_p12  ;;  %p2100_p8 = por %p2099_p4, %p2098_p1 }
  0x27   : > { %p2094_p6 = pneg %p2093_p9 }
  0x29   : > { %p2101_p2 = pnand %p2100_p8, %p2094_p6 }
  0x2b   : > { %2104 = shalt.err (!%p2101_p2)
}
  0x2c   : > { %s2256_s10 = smov 64   ;;  %s2257_s11 = smov 4  }
  0x2d   : > { %1893 = dma.hbm_to_vmem [thread:$0]  (!%p2348_p10), %s2861_s1, 2048, %s163_s26, [#allocation6], %s2256_s10, %s2256_s10, %s2257_s11  }
  0x2e   : > { %p38_p1 = scmp.ge.s32.totalorder %s36_s28, 4  ;;  %s45_s25 = sadd.s32 1, %s2241_s14 }
  0x2f   : > { %p52_p2 = scmp.ne.s32.totalorder %s2241_s14, %s2237_s13  ;;  %p53_p4 = scmp.eq.s32.totalorder %s2253_s17, 0 }
  0x30   : > { %s2888_s28 = smov (%p38_p1, %s36_s28), 0  ;;  %p2875_p8 = scmp.ne.s32.totalorder %s2869_s21, 0 }
  0x31   : > { %p2375_p6 = por %p53_p4, %p52_p2  ;;  %s40_s27 = ssub.s32 %s2249_s16, %s2888_s28 }
  0x32   : > { %p2381_p11 = por %p2875_p8, %p52_p2  ;;  %p1906_p12 = scmp.lt.s32.totalorder %s2253_s17, 4 }
  0x33   : > { %p43_p10 = scmp.eq.s32.totalorder %s40_s27, 0  ;;  %s176_s26 = sand.u32 1, %s2241_s14  }
  0x34   : > { %s1749_s4 = sshll.u32 %s176_s26, 9  ;;  %s1846_s6 = sshll.u32 %s2249_s16, 13 }
  0x35   : > { %s2390_s5 = scalar_select %p43_p10, %s2241_s14, %s45_s25  }
  0x36   : > { %s2396_s9 = scalar_lea.hbm %s2860_s0, %s1846_s6  ;;  %s180_s21 = scalar_lea.vmem [#allocation2], %s1749_s4 }
  0x37   : > { %s190_s10 = sshll.u32 %s180_s21, 4  ;;  %p2402_p13 = pnand %p1906_p12, %p2375_p6  ;;  %s2398_s10 = int_to_ptr.vmem [resolvable:$true] %s190_s10 }
  0x38   : > { %s2406_s18 = scalar_lea.sflag [#allocation3], %s176_s26  ;;  %s2105_s19 = scalar_lea.hbm %s2396_s9, 8192 }
  0x39   : > { %p2106_p0 = scmp.ne.s32.totalorder %s2396_s9, %s2105_s19  ;;  %p2107_p3 = pneg %p2402_p13 }
  0x3a   : > { %s2110_s29 = scalar_lea.hbm %s2860_s0, 32768  ;;  %p2111_p9 = scmp.lt.u32.totalorder %s2396_s9, %s2860_s0 }
  0x3b   : > { %p2108_p5 = pnand %p2107_p3, %p2106_p0  ;;  %p2112_p1 = scmp.lt.u32.totalorder %s2110_s29, %s2105_s19 }
  0x3c   : > { %p2114_p4 = scmp.lt.u32.totalorder %s2105_s19, %s2396_s9 }
  0x3d   : > { %p2109_p7 = pneg %p2108_p5  ;;  %p2113_p2 = por %p2112_p1, %p2111_p9 }
  0x3f   : > { %p2115_p6 = por %p2114_p4, %p2113_p2 }
  0x41   : > { %p2116_p8 = pnand %p2115_p6, %p2109_p7 }
  0x43   : > { %2119 = shalt.err (!%p2116_p8)
}
  0x44   : > { %s2120_s26 = scalar_lea.vmem %s2398_s10, 8192  ;;  %s2258_s7 = smov [#allocation2]  }
  0x45   : > { %p2121_p12 = scmp.ne.s32.totalorder %s2398_s10, %s2120_s26  ;;  %s2125_s8 = sshll.u32 %s2258_s7, 4  ;;  %s2126_s8 = int_to_ptr.vmem [resolvable:$false] %s2125_s8 }
  0x46   : > { %s2127_s21 = scalar_lea.vmem %s2126_s8, 16384  ;;  %p2128_p5 = scmp.lt.s32.totalorder %s2398_s10, %s2126_s8 }
  0x47   : > { %p2123_p10 = pnand %p2121_p12, %p2107_p3  ;;  %p2129_p9 = scmp.lt.s32.totalorder %s2127_s21, %s2120_s26 }
  0x49   : > { %p2124_p0 = pneg %p2123_p10  ;;  %p2130_p1 = por %p2129_p9, %p2128_p5 }
  0x4b   : > { %p2131_p2 = pnand %p2130_p1, %p2124_p0 }
  0x4d   : > { %2134 = shalt.err (!%p2131_p2)
}
  0x4e   : > { %s2259_s19 = smov 128   ;;  %s2260_s25 = smov 8  }
  0x4f   : > { %1897 = dma.hbm_to_vmem [thread:$0]  (!%p2402_p13), %s2396_s9, 8192, %s2398_s10, %s2406_s18, %s2259_s19, %s2259_s19, %s2260_s25  }
  0x50   : > { %p2878_p3 = scmp.ne.s32.totalorder %s2872_s24, 0 }
  0x51   : > { %s2437_s27 = sand.u32 (!%p2878_p3), 1, %s2237_s13   ;;  %p2879_p7 = scmp.ne.s32.totalorder (!%p2878_p3), %s2870_s22, 0 }
  0x52   : > { %202 = sbr.rel (%p2878_p3) target bundleno = 599 (0x257), region = 28  ;;  %s1754_s29 = sshll.u32 (!%p2878_p3), %s2437_s27, 9 }
  0x53   : > { %s205_s4 = scalar_lea.sflag (!%p2878_p3), [#allocation3], %s2437_s27  ;;  %s2443_s6 = scalar_lea.vmem (!%p2878_p3), [#allocation2], %s1754_s29 }
  0x59   : > { %2216 = dma.done.wait (%p2879_p7), %s205_s4, 8192  }
  0x5a   : > { %2218 = vsyncadd (%p2879_p7), %s205_s4, 4294959104  ;;  %p2880_p13 = scmp.ne.s32.totalorder %s2868_s20, 0 }
  0x5c   : > { %2220 = dma.done.wait (%p2880_p13), [#allocation6], 2048  }
  0x5d   : > { %2222 = vsyncadd (%p2880_p13), [#allocation6], 4294965248  ;;  %v2261_v0 = vmov 0   ;;  %v1965_v1 = vld [vmem:[#allocation5] sm:$0xff]   ;;  %v1966_v2 = vld [vmem:[#allocation5 + $0x8] sm:$0xff]   ;;  %s2553_s20 = scalar_lea.vmem [#allocation7], %s1754_s29 }
  0x5e   : > { %757 = vmatprep.subr.bf16.mxu0 %v2261_v0  ;;  %1848 = vmatprep.subr.bf16.mxu1 %v2261_v0  ;;  %v1967_v3 = vld [vmem:[#allocation5 + $0x10] sm:$0xff]   ;;  %v1968_v4 = vld [vmem:[#allocation5 + $0x18] sm:$0xff]   ;;  %v1969_v5 = vld [vmem:[#allocation5 + $0x20] sm:$0xff]   ;;  %s1847_s22 = sshll.u32 %s2245_s15, 13  ;;  %s1603_s24 = sshll.u32 %s2553_s20, 4  ;;  %s2695_s24 = int_to_ptr.vmem [resolvable:$true] %s1603_s24 }
  0x5f   : > { %758 = vmatpush1.bf16.msra.mxu0 %v1965_v1  ;;  %1864 = vmatpush1.bf16.msra.mxu1 %v1965_v1  ;;  %v1983_v6 = vld [vmem:[%s2443_s6 + $0x4] ss:$8 sps:$4 sm:$0xff]   ;;  %v1971_v8 = vld [vmem:[#allocation5 + $0x30] sm:$0xff]   ;;  %v1972_v9 = vld [vmem:[#allocation5 + $0x38] sm:$0xff]   ;;  %s2693_s11 = scalar_lea.hbm %s2862_s2, %s1847_s22  ;;  %s1585_s18 = scalar_lea.sflag [#allocation4], %s2437_s27 }
  0x60   : > { %759 = vmatprep.subr.bf16.mxu0 %v2261_v0  ;;  %1849 = vmatprep.subr.bf16.mxu1 %v2261_v0  ;;  %v1970_v7 = vld [vmem:[#allocation5 + $0x28] sm:$0xff]   ;;  %v1973_v11 = vld [vmem:[#allocation5 + $0x40] sm:$0xff]   ;;  %v1975_v13 = vld [vmem:[#allocation5 + $0x50] sm:$0xff]   ;;  %s2135_s26 = scalar_lea.vmem %s2695_s24, 8192  ;;  %s2262_s7 = smov [#allocation7]  }
  0x61   : > { %789 = vmatprep.mubr.bf16.mxu0 %v1983_v6  ;;  %v2007_v10 = vld [vmem:[%s2443_s6 + $0x104] ss:$8 sps:$4 sm:$0xff]   ;;  %v1976_v14 = vld [vmem:[#allocation5 + $0x58] sm:$0xff]   ;;  %v1979_v17 = vld [vmem:[#allocation5 + $0x70] sm:$0xff]   ;;  %p2136_p4 = scmp.ne.s32.totalorder %s2695_s24, %s2135_s26  ;;  %s2139_s8 = sshll.u32 %s2262_s7, 4  ;;  %s2140_s8 = int_to_ptr.vmem [resolvable:$false] %s2139_s8 }
  0x62   : > { %917 = vmatprep.mubr.bf16.mxu1 %v2007_v10  ;;  %v1974_v12 = vld [vmem:[#allocation5 + $0x48] sm:$0xff]   ;;  %v1977_v15 = vld [vmem:[#allocation5 + $0x60] sm:$0xff]   ;;  %v1980_v18 = vld [vmem:[#allocation5 + $0x78] sm:$0xff]   ;;  %s2141_s21 = scalar_lea.vmem %s2140_s8, 16384  ;;  %p2142_p12 = scmp.lt.s32.totalorder %s2695_s24, %s2140_s8 }
  0x63   : > { %760 = vmatpush1.bf16.msra.mxu0 %v1966_v2  ;;  %1865 = vmatpush1.bf16.msra.mxu1 %v1966_v2  ;;  %v1978_v16 = vld [vmem:[#allocation5 + $0x68] sm:$0xff]   ;;  %v1984_v21 = vld [vmem:[%s2443_s6 + $0x14] ss:$8 sps:$4 sm:$0xff]   ;;  %v1986_v23 = vld [vmem:[%s2443_s6 + $0x10] ss:$8 sps:$4 sm:$0xff]   ;;  %p2137_p6 = pnand %p2136_p4, %p2381_p11  ;;  %p2143_p10 = scmp.lt.s32.totalorder %s2141_s21, %s2135_s26 }
  0x64   : > { %761 = vmatprep.subr.bf16.mxu0 %v2261_v0  ;;  %1850 = vmatprep.subr.bf16.mxu1 %v2261_v0  ;;  %v1981_v19 = vld [vmem:[%s2443_s6] ss:$8 sps:$4 sm:$0xff]   ;;  %v2011_v22 = vld [vmem:[%s2443_s6 + $0x114] ss:$8 sps:$4 sm:$0xff]   ;;  %v2013_v24 = vld [vmem:[%s2443_s6 + $0x110] ss:$8 sps:$4 sm:$0xff]  }
  0x65   : > { %v2005_v20 = vld [vmem:[%s2443_s6 + $0x100] ss:$8 sps:$4 sm:$0xff]   ;;  %v1987_v25 = vld [vmem:[%s2443_s6 + $0x24] ss:$8 sps:$4 sm:$0xff]   ;;  %v1990_v29 = vld [vmem:[%s2443_s6 + $0x34] ss:$8 sps:$4 sm:$0xff]   ;;  %p2138_p8 = pneg %p2137_p6  ;;  %p2144_p0 = por %p2143_p10, %p2142_p12 }
  0x66   : > { %v2017_v26 = vld [vmem:[%s2443_s6 + $0x124] ss:$8 sps:$4 sm:$0xff]   ;;  %v1989_v27 = vld [vmem:[%s2443_s6 + $0x20] ss:$8 sps:$4 sm:$0xff]   ;;  %v2023_v30 = vld [vmem:[%s2443_s6 + $0x134] ss:$8 sps:$4 sm:$0xff]  }
  0x67   : > { %762 = vmatpush1.bf16.msra.mxu0 %v1967_v3  ;;  %1866 = vmatpush1.bf16.msra.mxu1 %v1967_v3  ;;  %v2019_v28 = vld [vmem:[%s2443_s6 + $0x120] ss:$8 sps:$4 sm:$0xff]   ;;  %v1992_v31 = vld [vmem:[%s2443_s6 + $0x30] ss:$8 sps:$4 sm:$0xff]   ;;  %v1993_v33 = vld [vmem:[%s2443_s6 + $0x44] ss:$8 sps:$4 sm:$0xff]   ;;  %p2145_p5 = pnand %p2144_p0, %p2138_p8 }
  0x68   : > { %763 = vmatprep.subr.bf16.mxu0 %v2261_v0  ;;  %1851 = vmatprep.subr.bf16.mxu1 %v2261_v0  ;;  %v2025_v32 = vld [vmem:[%s2443_s6 + $0x130] ss:$8 sps:$4 sm:$0xff]   ;;  %v2029_v34 = vld [vmem:[%s2443_s6 + $0x144] ss:$8 sps:$4 sm:$0xff]   ;;  %v1995_v35 = vld [vmem:[%s2443_s6 + $0x40] ss:$8 sps:$4 sm:$0xff]  }
  0x69   : > { %v2031_v36 = vld [vmem:[%s2443_s6 + $0x140] ss:$8 sps:$4 sm:$0xff]   ;;  %v1996_v37 = vld [vmem:[%s2443_s6 + $0x54] ss:$8 sps:$4 sm:$0xff]   ;;  %v1998_v39 = vld [vmem:[%s2443_s6 + $0x50] ss:$8 sps:$4 sm:$0xff]  }
  0x6a   : > { %v2035_v38 = vld [vmem:[%s2443_s6 + $0x154] ss:$8 sps:$4 sm:$0xff]   ;;  %v2037_v40 = vld [vmem:[%s2443_s6 + $0x150] ss:$8 sps:$4 sm:$0xff]   ;;  %v1999_v41 = vld [vmem:[%s2443_s6 + $0x64] ss:$8 sps:$4 sm:$0xff]  }
  0x6b   : > { %764 = vmatpush1.bf16.msra.mxu0 %v1968_v4  ;;  %1867 = vmatpush1.bf16.msra.mxu1 %v1968_v4  ;;  %v2041_v42 = vld [vmem:[%s2443_s6 + $0x164] ss:$8 sps:$4 sm:$0xff]   ;;  %v2001_v43 = vld [vmem:[%s2443_s6 + $0x60] ss:$8 sps:$4 sm:$0xff]   ;;  %v2002_v45 = vld [vmem:[%s2443_s6 + $0x74] ss:$8 sps:$4 sm:$0xff]  }
  0x6c   : > { %765 = vmatprep.subr.bf16.mxu0 %v2261_v0  ;;  %1852 = vmatprep.subr.bf16.mxu1 %v2261_v0  ;;  %v2043_v44 = vld [vmem:[%s2443_s6 + $0x160] ss:$8 sps:$4 sm:$0xff]   ;;  %v2047_v46 = vld [vmem:[%s2443_s6 + $0x174] ss:$8 sps:$4 sm:$0xff]   ;;  %v2004_v47 = vld [vmem:[%s2443_s6 + $0x70] ss:$8 sps:$4 sm:$0xff]  }
  0x6d   : > { %v2049_v48 = vld [vmem:[%s2443_s6 + $0x170] ss:$8 sps:$4 sm:$0xff]   ;;  %v2008_v49 = vld [vmem:[%s2443_s6 + $0x84] ss:$8 sps:$4 sm:$0xff]   ;;  %v2010_v51 = vld [vmem:[%s2443_s6 + $0x80] ss:$8 sps:$4 sm:$0xff]  }
  0x6e   : > { %v2053_v50 = vld [vmem:[%s2443_s6 + $0x184] ss:$8 sps:$4 sm:$0xff]   ;;  %v2055_v52 = vld [vmem:[%s2443_s6 + $0x180] ss:$8 sps:$4 sm:$0xff]   ;;  %v2014_v53 = vld [vmem:[%s2443_s6 + $0x94] ss:$8 sps:$4 sm:$0xff]  }
  0x6f   : > { %766 = vmatpush1.bf16.msra.mxu0 %v1969_v5  ;;  %1868 = vmatpush1.bf16.msra.mxu1 %v1969_v5  ;;  %v2056_v54 = vld [vmem:[%s2443_s6 + $0x194] ss:$8 sps:$4 sm:$0xff]   ;;  %v2016_v55 = vld [vmem:[%s2443_s6 + $0x90] ss:$8 sps:$4 sm:$0xff]   ;;  %v2020_v57 = vld [vmem:[%s2443_s6 + $0xa4] ss:$8 sps:$4 sm:$0xff]  }
  0x70   : > { %767 = vmatprep.subr.bf16.mxu0 %v2261_v0  ;;  %1853 = vmatprep.subr.bf16.mxu1 %v2261_v0  ;;  %v2058_v56 = vld [vmem:[%s2443_s6 + $0x190] ss:$8 sps:$4 sm:$0xff]   ;;  %v2059_v58 = vld [vmem:[%s2443_s6 + $0x1a4] ss:$8 sps:$4 sm:$0xff]   ;;  %v2022_v59 = vld [vmem:[%s2443_s6 + $0xa0] ss:$8 sps:$4 sm:$0xff]  }
  0x71   : > { %v2061_v60 = vld [vmem:[%s2443_s6 + $0x1a0] ss:$8 sps:$4 sm:$0xff]   ;;  %v2026_v61 = vld [vmem:[%s2443_s6 + $0xb4] ss:$8 sps:$4 sm:$0xff]   ;;  %v2028_v63 = vld [vmem:[%s2443_s6 + $0xb0] ss:$8 sps:$4 sm:$0xff]  }
  0x72   : > { %v2062_v62 = vld [vmem:[%s2443_s6 + $0x1b4] ss:$8 sps:$4 sm:$0xff]   ;;  %v2032_v1 = vld [vmem:[%s2443_s6 + $0xc4] ss:$8 sps:$4 sm:$0xff]   ;;  %v2034_v3 = vld [vmem:[%s2443_s6 + $0xc0] ss:$8 sps:$4 sm:$0xff]  }
  0x73   : > { %768 = vmatpush1.bf16.msra.mxu0 %v1970_v7  ;;  %1869 = vmatpush1.bf16.msra.mxu1 %v1970_v7  ;;  %v2065_v2 = vld [vmem:[%s2443_s6 + $0x1c4] ss:$8 sps:$4 sm:$0xff]   ;;  %v2067_v4 = vld [vmem:[%s2443_s6 + $0x1c0] ss:$8 sps:$4 sm:$0xff]   ;;  %v2038_v5 = vld [vmem:[%s2443_s6 + $0xd4] ss:$8 sps:$4 sm:$0xff]  }
  0x74   : > { %769 = vmatprep.subr.bf16.mxu0 %v2261_v0  ;;  %1854 = vmatprep.subr.bf16.mxu1 %v2261_v0  ;;  %v2068_v6 = vld [vmem:[%s2443_s6 + $0x1d4] ss:$8 sps:$4 sm:$0xff]   ;;  %v2040_v7 = vld [vmem:[%s2443_s6 + $0xd0] ss:$8 sps:$4 sm:$0xff]   ;;  %v2071_v10 = vld [vmem:[%s2443_s6 + $0x1e4] ss:$8 sps:$4 sm:$0xff]  }
  0x77   : > { %770 = vmatpush1.bf16.msra.mxu0 %v1971_v8  ;;  %1870 = vmatpush1.bf16.msra.mxu1 %v1971_v8  ;;  %v2070_v8 = vld [vmem:[%s2443_s6 + $0x1d0] ss:$8 sps:$4 sm:$0xff]  }
  0x78   : > { %771 = vmatprep.subr.bf16.mxu0 %v2261_v0  ;;  %1855 = vmatprep.subr.bf16.mxu1 %v2261_v0 }
  0x7b   : > { %772 = vmatpush1.bf16.msra.mxu0 %v1972_v9  ;;  %1871 = vmatpush1.bf16.msra.mxu1 %v1972_v9  ;;  %v2044_v9 = vld [vmem:[%s2443_s6 + $0xe4] ss:$8 sps:$4 sm:$0xff]  }
  0x7c   : > { %773 = vmatprep.subr.bf16.mxu0 %v2261_v0  ;;  %1856 = vmatprep.subr.bf16.mxu1 %v2261_v0 }
  0x7f   : > { %774 = vmatpush1.bf16.msra.mxu0 %v1973_v11  ;;  %1872 = vmatpush1.bf16.msra.mxu1 %v1973_v11  ;;  %v2046_v11 = vld [vmem:[%s2443_s6 + $0xe0] ss:$8 sps:$4 sm:$0xff]  }
  0x80   : > { %775 = vmatprep.subr.bf16.mxu0 %v2261_v0  ;;  %1857 = vmatprep.subr.bf16.mxu1 %v2261_v0 }
  0x83   : > { %776 = vmatpush1.bf16.msra.mxu0 %v1974_v12  ;;  %1873 = vmatpush1.bf16.msra.mxu1 %v1974_v12  ;;  %v2073_v12 = vld [vmem:[%s2443_s6 + $0x1e0] ss:$8 sps:$4 sm:$0xff]  }
  0x84   : > { %777 = vmatprep.subr.bf16.mxu0 %v2261_v0  ;;  %1858 = vmatprep.subr.bf16.mxu1 %v2261_v0 }
  0x87   : > { %778 = vmatpush1.bf16.msra.mxu0 %v1975_v13  ;;  %1874 = vmatpush1.bf16.msra.mxu1 %v1975_v13  ;;  %v2050_v13 = vld [vmem:[%s2443_s6 + $0xf4] ss:$8 sps:$4 sm:$0xff]  }
  0x88   : > { %779 = vmatprep.subr.bf16.mxu0 %v2261_v0  ;;  %1859 = vmatprep.subr.bf16.mxu1 %v2261_v0 }
  0x8b   : > { %780 = vmatpush1.bf16.msra.mxu0 %v1976_v14  ;;  %1875 = vmatpush1.bf16.msra.mxu1 %v1976_v14  ;;  %v2074_v14 = vld [vmem:[%s2443_s6 + $0x1f4] ss:$8 sps:$4 sm:$0xff]  }
  0x8c   : > { %781 = vmatprep.subr.bf16.mxu0 %v2261_v0  ;;  %1860 = vmatprep.subr.bf16.mxu1 %v2261_v0 }
  0x8f   : > { %782 = vmatpush1.bf16.msra.mxu0 %v1977_v15  ;;  %1876 = vmatpush1.bf16.msra.mxu1 %v1977_v15  ;;  %v2052_v15 = vld [vmem:[%s2443_s6 + $0xf0] ss:$8 sps:$4 sm:$0xff]  }
  0x90   : > { %783 = vmatprep.subr.bf16.mxu0 %v2261_v0  ;;  %1861 = vmatprep.subr.bf16.mxu1 %v2261_v0 }
  0x93   : > { %784 = vmatpush1.bf16.msra.mxu0 %v1978_v16  ;;  %1877 = vmatpush1.bf16.msra.mxu1 %v1978_v16  ;;  %v2076_v16 = vld [vmem:[%s2443_s6 + $0x1f0] ss:$8 sps:$4 sm:$0xff]  }
  0x94   : > { %785 = vmatprep.subr.bf16.mxu0 %v2261_v0  ;;  %1862 = vmatprep.subr.bf16.mxu1 %v2261_v0 }
  0x97   : > { %786 = vmatpush1.bf16.msra.mxu0 %v1979_v17  ;;  %1878 = vmatpush1.bf16.msra.mxu1 %v1979_v17 }
  0x98   : > { %787 = vmatprep.subr.bf16.mxu0 %v2261_v0  ;;  %1863 = vmatprep.subr.bf16.mxu1 %v2261_v0  ;;  %v2064_v0 = vld [vmem:[%s2443_s6 + $0x1b0] ss:$8 sps:$4 sm:$0xff]  }
  0x9b   : > { %788 = vmatpush1.bf16.msra.mxu0 %v1980_v18  ;;  %1879 = vmatpush1.bf16.msra.mxu1 %v1980_v18 }
  0x9e   : > { %790 = vmatmul.mubr.bf16.vlgmr.msra.gmra.mrb[0].mxu0 %v1981_v19  ;;  %918 = vmatmul.mubr.bf16.vlgmr.msra.gmra.mrb[0].mxu1 %v2005_v20 }
  0x9f   : > { %797 = vmatprep.mubr.bf16.mxu0 %v1984_v21  ;;  %925 = vmatprep.mubr.bf16.mxu1 %v2011_v22 }
  0xa6   : > { %798 = vmatmul.mubr.bf16.gmra.mrb[4].mxu0 %v1986_v23  ;;  %926 = vmatmul.mubr.bf16.gmra.mrb[4].mxu1 %v2013_v24 }
  0xa7   : > { %805 = vmatprep.mubr.bf16.mxu0 %v1987_v25  ;;  %933 = vmatprep.mubr.bf16.mxu1 %v2017_v26 }
  0xae   : > { %806 = vmatmul.mubr.bf16.gmra.mrb[8].mxu0 %v1989_v27  ;;  %934 = vmatmul.mubr.bf16.gmra.mrb[8].mxu1 %v2019_v28 }
  0xaf   : > { %813 = vmatprep.mubr.bf16.mxu0 %v1990_v29  ;;  %941 = vmatprep.mubr.bf16.mxu1 %v2023_v30 }
  0xb6   : > { %814 = vmatmul.mubr.bf16.gmra.mrb[12].mxu0 %v1992_v31  ;;  %942 = vmatmul.mubr.bf16.gmra.mrb[12].mxu1 %v2025_v32 }
  0xb7   : > { %821 = vmatprep.mubr.bf16.mxu0 %v1993_v33  ;;  %949 = vmatprep.mubr.bf16.mxu1 %v2029_v34 }
  0xbe   : > { %822 = vmatmul.mubr.bf16.gmra.mrb[16].mxu0 %v1995_v35  ;;  %950 = vmatmul.mubr.bf16.gmra.mrb[16].mxu1 %v2031_v36 }
  0xbf   : > { %829 = vmatprep.mubr.bf16.mxu0 %v1996_v37  ;;  %957 = vmatprep.mubr.bf16.mxu1 %v2035_v38 }
  0xc6   : > { %830 = vmatmul.mubr.bf16.gmra.mrb[20].mxu0 %v1998_v39  ;;  %958 = vmatmul.mubr.bf16.gmra.mrb[20].mxu1 %v2037_v40 }
  0xc7   : > { %837 = vmatprep.mubr.bf16.mxu0 %v1999_v41  ;;  %965 = vmatprep.mubr.bf16.mxu1 %v2041_v42 }
  0xce   : > { %838 = vmatmul.mubr.bf16.gmra.mrb[24].mxu0 %v2001_v43  ;;  %966 = vmatmul.mubr.bf16.gmra.mrb[24].mxu1 %v2043_v44 }
  0xcf   : > { %845 = vmatprep.mubr.bf16.mxu0 %v2002_v45  ;;  %973 = vmatprep.mubr.bf16.mxu1 %v2047_v46 }
  0xd6   : > { %846 = vmatmul.mubr.bf16.gmra.mrb[28].mxu0 %v2004_v47  ;;  %974 = vmatmul.mubr.bf16.gmra.mrb[28].mxu1 %v2049_v48 }
  0xd7   : > { %853 = vmatprep.mubr.bf16.mxu0 %v2008_v49  ;;  %981 = vmatprep.mubr.bf16.mxu1 %v2053_v50 }
  0xde   : > { %854 = vmatmul.mubr.bf16.gmra.mrb[32].mxu0 %v2010_v51  ;;  %982 = vmatmul.mubr.bf16.gmra.mrb[32].mxu1 %v2055_v52 }
  0xdf   : > { %861 = vmatprep.mubr.bf16.mxu0 %v2014_v53  ;;  %989 = vmatprep.mubr.bf16.mxu1 %v2056_v54 }
  0xe6   : > { %862 = vmatmul.mubr.bf16.gmra.mrb[36].mxu0 %v2016_v55  ;;  %990 = vmatmul.mubr.bf16.gmra.mrb[36].mxu1 %v2058_v56 }
  0xe7   : > { %869 = vmatprep.mubr.bf16.mxu0 %v2020_v57  ;;  %997 = vmatprep.mubr.bf16.mxu1 %v2059_v58 }
  0xee   : > { %870 = vmatmul.mubr.bf16.gmra.mrb[40].mxu0 %v2022_v59  ;;  %998 = vmatmul.mubr.bf16.gmra.mrb[40].mxu1 %v2061_v60 }
  0xef   : > { %877 = vmatprep.mubr.bf16.mxu0 %v2026_v61  ;;  %1005 = vmatprep.mubr.bf16.mxu1 %v2062_v62 }
  0xf6   : > { %878 = vmatmul.mubr.bf16.gmra.mrb[44].mxu0 %v2028_v63  ;;  %1006 = vmatmul.mubr.bf16.gmra.mrb[44].mxu1 %v2064_v0 }
  0xf7   : > { %885 = vmatprep.mubr.bf16.mxu0 %v2032_v1  ;;  %1013 = vmatprep.mubr.bf16.mxu1 %v2065_v2 }
  0xfe   : > { %886 = vmatmul.mubr.bf16.gmra.mrb[48].mxu0 %v2034_v3  ;;  %1014 = vmatmul.mubr.bf16.gmra.mrb[48].mxu1 %v2067_v4 }
  0xff   : > { %893 = vmatprep.mubr.bf16.mxu0 %v2038_v5  ;;  %1021 = vmatprep.mubr.bf16.mxu1 %v2068_v6 }
 0x106   : > { %894 = vmatmul.mubr.bf16.gmra.mrb[52].mxu0 %v2040_v7  ;;  %1022 = vmatmul.mubr.bf16.gmra.mrb[52].mxu1 %v2070_v8 }
 0x107   : > { %901 = vmatprep.mubr.bf16.mxu0 %v2044_v9  ;;  %1029 = vmatprep.mubr.bf16.mxu1 %v2071_v10 }
 0x10e   : > { %902 = vmatmul.mubr.bf16.gmra.mrb[56].mxu0 %v2046_v11  ;;  %1030 = vmatmul.mubr.bf16.gmra.mrb[56].mxu1 %v2073_v12 }
 0x10f   : > { %909 = vmatprep.mubr.bf16.mxu0 %v2050_v13  ;;  %1037 = vmatprep.mubr.bf16.mxu1 %v2074_v14 }
 0x116   : > { %910 = vmatmul.mubr.bf16.gmra.mrb[60].mxu0 %v2052_v15  ;;  %1038 = vmatmul.mubr.bf16.gmra.mrb[60].mxu1 %v2076_v16 }
 0x171   : > { %v791_v17 = vpop.f32.mrb[0].mxu0  ;;  %v2549_v18 = vpop.f32.mrb[0].mxu1 }
 0x172   : > { %1050 = vst [vmem:[%s2553_s20] sm:$0xff] %v791_v17  ;;  %v793_v19 = vpop.f32.mrb[1].mxu0  ;;  %1082 = vst [vmem:[%s2553_s20 + $0x100] sm:$0xff] %v2549_v18  ;;  %v921_v20 = vpop.f32.mrb[1].mxu1  ;;  %v1446_v23 = vmul.f32 %v791_v17, %v791_v17 }
 0x173   : > { %v794_v21 = vpop.f32.mrb[2].mxu0  ;;  %v2558_v22 = vpop.f32.mrb[2].mxu1 }
 0x174   : > { %1051 = vst [vmem:[%s2553_s20 + $0x8] sm:$0xff] %v794_v21  ;;  %v1377_v24 = vadd.f32 %v794_v21, %v791_v17  ;;  %v1447_v25 = vmul.f32 %v794_v21, %v794_v21  ;;  %v796_v26 = vpop.f32.mrb[3].mxu0  ;;  %1083 = vst [vmem:[%s2553_s20 + $0x108] sm:$0xff] %v2558_v22  ;;  %v924_v27 = vpop.f32.mrb[3].mxu1 }
 0x176   : > { %v1510_v28 = vadd.f32 %v1447_v25, %v1446_v23 }
 0x179   : > { %v799_v29 = vpop.f32.mrb[4].mxu0  ;;  %v2563_v30 = vpop.f32.mrb[4].mxu1 }
 0x17a   : > { %1052 = vst [vmem:[%s2553_s20 + $0x10] sm:$0xff] %v799_v29  ;;  %v1378_v31 = vadd.f32 %v1377_v24, %v799_v29  ;;  %v1448_v32 = vmul.f32 %v799_v29, %v799_v29  ;;  %v801_v33 = vpop.f32.mrb[5].mxu0  ;;  %1084 = vst [vmem:[%s2553_s20 + $0x110] sm:$0xff] %v2563_v30  ;;  %v929_v34 = vpop.f32.mrb[5].mxu1 }
 0x17b   : > { %v802_v35 = vpop.f32.mrb[6].mxu0  ;;  %v2568_v36 = vpop.f32.mrb[6].mxu1 }
 0x17c   : > { %v1511_v37 = vadd.f32 %v1510_v28, %v1448_v32  ;;  %1053 = vst [vmem:[%s2553_s20 + $0x18] sm:$0xff] %v802_v35  ;;  %v1379_v38 = vadd.f32 %v1378_v31, %v802_v35  ;;  %v1449_v39 = vmul.f32 %v802_v35, %v802_v35  ;;  %v804_v40 = vpop.f32.mrb[7].mxu0  ;;  %1085 = vst [vmem:[%s2553_s20 + $0x118] sm:$0xff] %v2568_v36  ;;  %v932_v41 = vpop.f32.mrb[7].mxu1 }
 0x17e   : > { %v1512_v42 = vadd.f32 %v1511_v37, %v1449_v39 }
 0x181   : > { %v807_v43 = vpop.f32.mrb[8].mxu0  ;;  %v2573_v44 = vpop.f32.mrb[8].mxu1 }
 0x182   : > { %1054 = vst [vmem:[%s2553_s20 + $0x20] sm:$0xff] %v807_v43  ;;  %v1380_v45 = vadd.f32 %v1379_v38, %v807_v43  ;;  %v1450_v46 = vmul.f32 %v807_v43, %v807_v43  ;;  %v809_v47 = vpop.f32.mrb[9].mxu0  ;;  %1086 = vst [vmem:[%s2553_s20 + $0x120] sm:$0xff] %v2573_v44  ;;  %v937_v48 = vpop.f32.mrb[9].mxu1 }
 0x183   : > { %v810_v49 = vpop.f32.mrb[10].mxu0  ;;  %v2578_v50 = vpop.f32.mrb[10].mxu1 }
 0x184   : > { %v1513_v51 = vadd.f32 %v1512_v42, %v1450_v46  ;;  %1055 = vst [vmem:[%s2553_s20 + $0x28] sm:$0xff] %v810_v49  ;;  %v1381_v52 = vadd.f32 %v1380_v45, %v810_v49  ;;  %v1451_v53 = vmul.f32 %v810_v49, %v810_v49  ;;  %v812_v54 = vpop.f32.mrb[11].mxu0  ;;  %1087 = vst [vmem:[%s2553_s20 + $0x128] sm:$0xff] %v2578_v50  ;;  %v940_v55 = vpop.f32.mrb[11].mxu1 }
 0x186   : > { %v1514_v56 = vadd.f32 %v1513_v51, %v1451_v53 }
 0x189   : > { %v815_v57 = vpop.f32.mrb[12].mxu0  ;;  %v2583_v58 = vpop.f32.mrb[12].mxu1 }
 0x18a   : > { %1056 = vst [vmem:[%s2553_s20 + $0x30] sm:$0xff] %v815_v57  ;;  %v1382_v59 = vadd.f32 %v1381_v52, %v815_v57  ;;  %v1452_v60 = vmul.f32 %v815_v57, %v815_v57  ;;  %v817_v61 = vpop.f32.mrb[13].mxu0  ;;  %1088 = vst [vmem:[%s2553_s20 + $0x130] sm:$0xff] %v2583_v58  ;;  %v945_v62 = vpop.f32.mrb[13].mxu1 }
 0x18b   : > { %v818_v63 = vpop.f32.mrb[14].mxu0  ;;  %v2588_v0 = vpop.f32.mrb[14].mxu1 }
 0x18c   : > { %v1515_v1 = vadd.f32 %v1514_v56, %v1452_v60  ;;  %1057 = vst [vmem:[%s2553_s20 + $0x38] sm:$0xff] %v818_v63  ;;  %v1383_v2 = vadd.f32 %v1382_v59, %v818_v63  ;;  %v1453_v3 = vmul.f32 %v818_v63, %v818_v63  ;;  %v820_v4 = vpop.f32.mrb[15].mxu0  ;;  %1089 = vst [vmem:[%s2553_s20 + $0x138] sm:$0xff] %v2588_v0  ;;  %v948_v5 = vpop.f32.mrb[15].mxu1 }
 0x18e   : > { %v1516_v6 = vadd.f32 %v1515_v1, %v1453_v3 }
 0x191   : > { %v823_v7 = vpop.f32.mrb[16].mxu0  ;;  %v2593_v8 = vpop.f32.mrb[16].mxu1 }
 0x192   : > { %1058 = vst [vmem:[%s2553_s20 + $0x40] sm:$0xff] %v823_v7  ;;  %v1384_v9 = vadd.f32 %v1383_v2, %v823_v7  ;;  %v1454_v10 = vmul.f32 %v823_v7, %v823_v7  ;;  %v825_v11 = vpop.f32.mrb[17].mxu0  ;;  %1090 = vst [vmem:[%s2553_s20 + $0x140] sm:$0xff] %v2593_v8  ;;  %v953_v12 = vpop.f32.mrb[17].mxu1 }
 0x193   : > { %v826_v13 = vpop.f32.mrb[18].mxu0  ;;  %v2598_v14 = vpop.f32.mrb[18].mxu1 }
 0x194   : > { %v1517_v15 = vadd.f32 %v1516_v6, %v1454_v10  ;;  %1059 = vst [vmem:[%s2553_s20 + $0x48] sm:$0xff] %v826_v13  ;;  %v1385_v16 = vadd.f32 %v1384_v9, %v826_v13  ;;  %v1455_v17 = vmul.f32 %v826_v13, %v826_v13  ;;  %v828_v19 = vpop.f32.mrb[19].mxu0  ;;  %1091 = vst [vmem:[%s2553_s20 + $0x148] sm:$0xff] %v2598_v14  ;;  %v956_v20 = vpop.f32.mrb[19].mxu1 }
 0x196   : > { %v1518_v21 = vadd.f32 %v1517_v15, %v1455_v17 }
 0x199   : > { %v831_v23 = vpop.f32.mrb[20].mxu0  ;;  %v2603_v24 = vpop.f32.mrb[20].mxu1 }
 0x19a   : > { %1060 = vst [vmem:[%s2553_s20 + $0x50] sm:$0xff] %v831_v23  ;;  %v1386_v25 = vadd.f32 %v1385_v16, %v831_v23  ;;  %v1456_v26 = vmul.f32 %v831_v23, %v831_v23  ;;  %v833_v27 = vpop.f32.mrb[21].mxu0  ;;  %1092 = vst [vmem:[%s2553_s20 + $0x150] sm:$0xff] %v2603_v24  ;;  %v961_v28 = vpop.f32.mrb[21].mxu1 }
 0x19b   : > { %v834_v29 = vpop.f32.mrb[22].mxu0  ;;  %v2608_v31 = vpop.f32.mrb[22].mxu1 }
 0x19c   : > { %v1519_v32 = vadd.f32 %v1518_v21, %v1456_v26  ;;  %1061 = vst [vmem:[%s2553_s20 + $0x58] sm:$0xff] %v834_v29  ;;  %v1387_v33 = vadd.f32 %v1386_v25, %v834_v29  ;;  %v1457_v34 = vmul.f32 %v834_v29, %v834_v29  ;;  %v836_v35 = vpop.f32.mrb[23].mxu0  ;;  %1093 = vst [vmem:[%s2553_s20 + $0x158] sm:$0xff] %v2608_v31  ;;  %v964_v37 = vpop.f32.mrb[23].mxu1 }
 0x19e   : > { %v1520_v38 = vadd.f32 %v1519_v32, %v1457_v34 }
 0x1a1   : > { %v839_v39 = vpop.f32.mrb[24].mxu0  ;;  %v2613_v40 = vpop.f32.mrb[24].mxu1 }
 0x1a2   : > { %1062 = vst [vmem:[%s2553_s20 + $0x60] sm:$0xff] %v839_v39  ;;  %v1388_v41 = vadd.f32 %v1387_v33, %v839_v39  ;;  %v1458_v42 = vmul.f32 %v839_v39, %v839_v39  ;;  %v841_v43 = vpop.f32.mrb[25].mxu0  ;;  %1094 = vst [vmem:[%s2553_s20 + $0x160] sm:$0xff] %v2613_v40  ;;  %v969_v45 = vpop.f32.mrb[25].mxu1 }
 0x1a3   : > { %v842_v46 = vpop.f32.mrb[26].mxu0  ;;  %v2618_v47 = vpop.f32.mrb[26].mxu1 }
 0x1a4   : > { %v1521_v48 = vadd.f32 %v1520_v38, %v1458_v42  ;;  %1063 = vst [vmem:[%s2553_s20 + $0x68] sm:$0xff] %v842_v46  ;;  %v1389_v49 = vadd.f32 %v1388_v41, %v842_v46  ;;  %v1459_v51 = vmul.f32 %v842_v46, %v842_v46  ;;  %v844_v52 = vpop.f32.mrb[27].mxu0  ;;  %1095 = vst [vmem:[%s2553_s20 + $0x168] sm:$0xff] %v2618_v47  ;;  %v972_v53 = vpop.f32.mrb[27].mxu1 }
 0x1a6   : > { %v1522_v54 = vadd.f32 %v1521_v48, %v1459_v51 }
 0x1a9   : > { %v847_v55 = vpop.f32.mrb[28].mxu0  ;;  %v2623_v56 = vpop.f32.mrb[28].mxu1 }
 0x1aa   : > { %1064 = vst [vmem:[%s2553_s20 + $0x70] sm:$0xff] %v847_v55  ;;  %v1390_v57 = vadd.f32 %v1389_v49, %v847_v55  ;;  %v1460_v59 = vmul.f32 %v847_v55, %v847_v55  ;;  %v849_v60 = vpop.f32.mrb[29].mxu0  ;;  %1096 = vst [vmem:[%s2553_s20 + $0x170] sm:$0xff] %v2623_v56  ;;  %v977_v61 = vpop.f32.mrb[29].mxu1 }
 0x1ab   : > { %v850_v62 = vpop.f32.mrb[30].mxu0  ;;  %v2628_v63 = vpop.f32.mrb[30].mxu1 }
 0x1ac   : > { %v1523_v1 = vadd.f32 %v1522_v54, %v1460_v59  ;;  %1065 = vst [vmem:[%s2553_s20 + $0x78] sm:$0xff] %v850_v62  ;;  %v1391_v2 = vadd.f32 %v1390_v57, %v850_v62  ;;  %v1461_v3 = vmul.f32 %v850_v62, %v850_v62  ;;  %v852_v4 = vpop.f32.mrb[31].mxu0  ;;  %1097 = vst [vmem:[%s2553_s20 + $0x178] sm:$0xff] %v2628_v63  ;;  %v980_v5 = vpop.f32.mrb[31].mxu1 }
 0x1ae   : > { %v1524_v6 = vadd.f32 %v1523_v1, %v1461_v3 }
 0x1b1   : > { %v855_v7 = vpop.f32.mrb[32].mxu0  ;;  %v2633_v9 = vpop.f32.mrb[32].mxu1 }
 0x1b2   : > { %1066 = vst [vmem:[%s2553_s20 + $0x80] sm:$0xff] %v855_v7  ;;  %v1392_v10 = vadd.f32 %v1391_v2, %v855_v7  ;;  %v1462_v11 = vmul.f32 %v855_v7, %v855_v7  ;;  %v857_v12 = vpop.f32.mrb[33].mxu0  ;;  %1098 = vst [vmem:[%s2553_s20 + $0x180] sm:$0xff] %v2633_v9  ;;  %v985_v13 = vpop.f32.mrb[33].mxu1 }
 0x1b3   : > { %v858_v15 = vpop.f32.mrb[34].mxu0  ;;  %v2638_v16 = vpop.f32.mrb[34].mxu1 }
 0x1b4   : > { %v1525_v17 = vadd.f32 %v1524_v6, %v1462_v11  ;;  %1067 = vst [vmem:[%s2553_s20 + $0x88] sm:$0xff] %v858_v15  ;;  %v1393_v19 = vadd.f32 %v1392_v10, %v858_v15  ;;  %v1463_v20 = vmul.f32 %v858_v15, %v858_v15  ;;  %v860_v21 = vpop.f32.mrb[35].mxu0  ;;  %1099 = vst [vmem:[%s2553_s20 + $0x188] sm:$0xff] %v2638_v16  ;;  %v988_v23 = vpop.f32.mrb[35].mxu1 }
 0x1b6   : > { %v1526_v25 = vadd.f32 %v1525_v17, %v1463_v20 }
 0x1b9   : > { %v863_v26 = vpop.f32.mrb[36].mxu0  ;;  %v2643_v27 = vpop.f32.mrb[36].mxu1 }
 0x1ba   : > { %1068 = vst [vmem:[%s2553_s20 + $0x90] sm:$0xff] %v863_v26  ;;  %v1394_v28 = vadd.f32 %v1393_v19, %v863_v26  ;;  %v1464_v29 = vmul.f32 %v863_v26, %v863_v26  ;;  %v865_v32 = vpop.f32.mrb[37].mxu0  ;;  %1100 = vst [vmem:[%s2553_s20 + $0x190] sm:$0xff] %v2643_v27  ;;  %v993_v33 = vpop.f32.mrb[37].mxu1 }
 0x1bb   : > { %v866_v34 = vpop.f32.mrb[38].mxu0  ;;  %v2648_v35 = vpop.f32.mrb[38].mxu1 }
 0x1bc   : > { %v1527_v37 = vadd.f32 %v1526_v25, %v1464_v29  ;;  %1069 = vst [vmem:[%s2553_s20 + $0x98] sm:$0xff] %v866_v34  ;;  %v1395_v38 = vadd.f32 %v1394_v28, %v866_v34  ;;  %v1465_v39 = vmul.f32 %v866_v34, %v866_v34  ;;  %v868_v41 = vpop.f32.mrb[39].mxu0  ;;  %1101 = vst [vmem:[%s2553_s20 + $0x198] sm:$0xff] %v2648_v35  ;;  %v996_v42 = vpop.f32.mrb[39].mxu1 }
 0x1be   : > { %v1528_v43 = vadd.f32 %v1527_v37, %v1465_v39 }
 0x1c1   : > { %v871_v45 = vpop.f32.mrb[40].mxu0  ;;  %v2653_v46 = vpop.f32.mrb[40].mxu1 }
 0x1c2   : > { %1070 = vst [vmem:[%s2553_s20 + $0xa0] sm:$0xff] %v871_v45  ;;  %v1396_v48 = vadd.f32 %v1395_v38, %v871_v45  ;;  %v1466_v49 = vmul.f32 %v871_v45, %v871_v45  ;;  %v873_v51 = vpop.f32.mrb[41].mxu0  ;;  %1102 = vst [vmem:[%s2553_s20 + $0x1a0] sm:$0xff] %v2653_v46  ;;  %v1001_v52 = vpop.f32.mrb[41].mxu1 }
 0x1c3   : > { %v874_v53 = vpop.f32.mrb[42].mxu0  ;;  %v2658_v54 = vpop.f32.mrb[42].mxu1 }
 0x1c4   : > { %v1529_v55 = vadd.f32 %v1528_v43, %v1466_v49  ;;  %1071 = vst [vmem:[%s2553_s20 + $0xa8] sm:$0xff] %v874_v53  ;;  %v1397_v57 = vadd.f32 %v1396_v48, %v874_v53  ;;  %v1467_v59 = vmul.f32 %v874_v53, %v874_v53  ;;  %v876_v60 = vpop.f32.mrb[43].mxu0  ;;  %1103 = vst [vmem:[%s2553_s20 + $0x1a8] sm:$0xff] %v2658_v54  ;;  %v1004_v61 = vpop.f32.mrb[43].mxu1 }
 0x1c6   : > { %v1530_v62 = vadd.f32 %v1529_v55, %v1467_v59 }
 0x1c9   : > { %v879_v1 = vpop.f32.mrb[44].mxu0  ;;  %v2663_v2 = vpop.f32.mrb[44].mxu1 }
 0x1ca   : > { %1072 = vst [vmem:[%s2553_s20 + $0xb0] sm:$0xff] %v879_v1  ;;  %v1398_v3 = vadd.f32 %v1397_v57, %v879_v1  ;;  %v1468_v4 = vmul.f32 %v879_v1, %v879_v1  ;;  %v881_v5 = vpop.f32.mrb[45].mxu0  ;;  %1104 = vst [vmem:[%s2553_s20 + $0x1b0] sm:$0xff] %v2663_v2  ;;  %v1009_v6 = vpop.f32.mrb[45].mxu1 }
 0x1cb   : > { %v882_v7 = vpop.f32.mrb[46].mxu0  ;;  %v2668_v10 = vpop.f32.mrb[46].mxu1 }
 0x1cc   : > { %v1531_v11 = vadd.f32 %v1530_v62, %v1468_v4  ;;  %1073 = vst [vmem:[%s2553_s20 + $0xb8] sm:$0xff] %v882_v7  ;;  %v1399_v12 = vadd.f32 %v1398_v3, %v882_v7  ;;  %v1469_v13 = vmul.f32 %v882_v7, %v882_v7  ;;  %v884_v15 = vpop.f32.mrb[47].mxu0  ;;  %1105 = vst [vmem:[%s2553_s20 + $0x1b8] sm:$0xff] %v2668_v10  ;;  %v1012_v17 = vpop.f32.mrb[47].mxu1 }
 0x1ce   : > { %v1532_v19 = vadd.f32 %v1531_v11, %v1469_v13 }
 0x1d1   : > { %v887_v20 = vpop.f32.mrb[48].mxu0  ;;  %v2673_v21 = vpop.f32.mrb[48].mxu1 }
 0x1d2   : > { %1074 = vst [vmem:[%s2553_s20 + $0xc0] sm:$0xff] %v887_v20  ;;  %v1400_v23 = vadd.f32 %v1399_v12, %v887_v20  ;;  %v1470_v25 = vmul.f32 %v887_v20, %v887_v20  ;;  %v889_v26 = vpop.f32.mrb[49].mxu0  ;;  %1106 = vst [vmem:[%s2553_s20 + $0x1c0] sm:$0xff] %v2673_v21  ;;  %v1017_v28 = vpop.f32.mrb[49].mxu1 }
 0x1d3   : > { %v890_v29 = vpop.f32.mrb[50].mxu0  ;;  %v1018_v32 = vpop.f32.mrb[50].mxu1 }
 0x1d4   : > { %v1533_v33 = vadd.f32 %v1532_v19, %v1470_v25  ;;  %1075 = vst [vmem:[%s2553_s20 + $0xc8] sm:$0xff] %v890_v29  ;;  %v1401_v34 = vadd.f32 %v1400_v23, %v890_v29  ;;  %v1471_v37 = vmul.f32 %v890_v29, %v890_v29  ;;  %v892_v38 = vpop.f32.mrb[51].mxu0  ;;  %1107 = vst [vmem:[%s2553_s20 + $0x1c8] sm:$0xff] %v1018_v32  ;;  %v1020_v39 = vpop.f32.mrb[51].mxu1 }
 0x1d6   : > { %v1534_v41 = vadd.f32 %v1533_v33, %v1471_v37 }
 0x1d9   : > { %v895_v42 = vpop.f32.mrb[52].mxu0  ;;  %v1023_v43 = vpop.f32.mrb[52].mxu1 }
 0x1da   : > { %1076 = vst [vmem:[%s2553_s20 + $0xd0] sm:$0xff] %v895_v42  ;;  %v1402_v45 = vadd.f32 %v1401_v34, %v895_v42  ;;  %v1472_v48 = vmul.f32 %v895_v42, %v895_v42  ;;  %v897_v49 = vpop.f32.mrb[53].mxu0  ;;  %1108 = vst [vmem:[%s2553_s20 + $0x1d0] sm:$0xff] %v1023_v43  ;;  %v1025_v51 = vpop.f32.mrb[53].mxu1 }
 0x1db   : > { %v898_v52 = vpop.f32.mrb[54].mxu0  ;;  %v1026_v53 = vpop.f32.mrb[54].mxu1 }
 0x1dc   : > { %v1535_v55 = vadd.f32 %v1534_v41, %v1472_v48  ;;  %1077 = vst [vmem:[%s2553_s20 + $0xd8] sm:$0xff] %v898_v52  ;;  %v1403_v57 = vadd.f32 %v1402_v45, %v898_v52  ;;  %v1473_v59 = vmul.f32 %v898_v52, %v898_v52  ;;  %v900_v60 = vpop.f32.mrb[55].mxu0  ;;  %1109 = vst [vmem:[%s2553_s20 + $0x1d8] sm:$0xff] %v1026_v53  ;;  %v1028_v61 = vpop.f32.mrb[55].mxu1 }
 0x1de   : > { %v1536_v62 = vadd.f32 %v1535_v55, %v1473_v59 }
 0x1e1   : > { %v903_v1 = vpop.f32.mrb[56].mxu0  ;;  %v1031_v3 = vpop.f32.mrb[56].mxu1 }
 0x1e2   : > { %1078 = vst [vmem:[%s2553_s20 + $0xe0] sm:$0xff] %v903_v1  ;;  %v1404_v4 = vadd.f32 %v1403_v57, %v903_v1  ;;  %v1474_v5 = vmul.f32 %v903_v1, %v903_v1  ;;  %v905_v6 = vpop.f32.mrb[57].mxu0  ;;  %1110 = vst [vmem:[%s2553_s20 + $0x1e0] sm:$0xff] %v1031_v3  ;;  %v1033_v7 = vpop.f32.mrb[57].mxu1 }
 0x1e3   : > { %v906_v11 = vpop.f32.mrb[58].mxu0  ;;  %v1034_v12 = vpop.f32.mrb[58].mxu1 }
 0x1e4   : > { %v1537_v13 = vadd.f32 %v1536_v62, %v1474_v5  ;;  %1079 = vst [vmem:[%s2553_s20 + $0xe8] sm:$0xff] %v906_v11  ;;  %v1405_v15 = vadd.f32 %v1404_v4, %v906_v11  ;;  %v1475_v17 = vmul.f32 %v906_v11, %v906_v11  ;;  %v908_v19 = vpop.f32.mrb[59].mxu0  ;;  %1111 = vst [vmem:[%s2553_s20 + $0x1e8] sm:$0xff] %v1034_v12  ;;  %v1036_v20 = vpop.f32.mrb[59].mxu1 }
 0x1e6   : > { %v1538_v23 = vadd.f32 %v1537_v13, %v1475_v17 }
 0x1e9   : > { %v911_v25 = vpop.f32.mrb[60].mxu0  ;;  %v1039_v26 = vpop.f32.mrb[60].mxu1 }
 0x1ea   : > { %1080 = vst [vmem:[%s2553_s20 + $0xf0] sm:$0xff] %v911_v25  ;;  %v1406_v28 = vadd.f32 %v1405_v15, %v911_v25  ;;  %v1476_v29 = vmul.f32 %v911_v25, %v911_v25  ;;  %v913_v32 = vpop.f32.mrb[61].mxu0  ;;  %1112 = vst [vmem:[%s2553_s20 + $0x1f0] sm:$0xff] %v1039_v26  ;;  %v1041_v33 = vpop.f32.mrb[61].mxu1 }
 0x1eb   : > { %v914_v34 = vpop.f32.mrb[62].mxu0  ;;  %v1042_v37 = vpop.f32.mrb[62].mxu1 }
 0x1ec   : > { %v1539_v38 = vadd.f32 %v1538_v23, %v1476_v29  ;;  %1081 = vst [vmem:[%s2553_s20 + $0xf8] sm:$0xff] %v914_v34  ;;  %v1407_v39 = vadd.f32 %v1406_v28, %v914_v34  ;;  %v1477_v41 = vmul.f32 %v914_v34, %v914_v34  ;;  %v916_v42 = vpop.f32.mrb[63].mxu0  ;;  %1113 = vst [vmem:[%s2553_s20 + $0x1f8] sm:$0xff] %v1042_v37  ;;  %v1044_v43 = vpop.f32.mrb[63].mxu1 }
 0x1ed   : > { %2148 = shalt.err (!%p2145_p5)
}
 0x1ee   : > { %s2149_s19 = scalar_lea.hbm %s2693_s11, 8192  ;;  %s2153_s4 = scalar_lea.hbm %s2862_s2, 32768 }
 0x1ef   : > { %p2150_p9 = scmp.ne.s32.totalorder %s2693_s11, %s2149_s19  ;;  %p2154_p3 = scmp.lt.u32.totalorder %s2693_s11, %s2862_s2 }
 0x1f0   : > { %p2155_p7 = scmp.lt.u32.totalorder %s2153_s4, %s2149_s19  ;;  %p2157_p4 = scmp.lt.u32.totalorder %s2149_s19, %s2693_s11 }
 0x1f1   : > { %p2151_p1 = pnand %p2150_p9, %p2381_p11 }
 0x1f2   : > { %p2156_p13 = por %p2155_p7, %p2154_p3 }
 0x1f3   : > { %p2152_p2 = pneg %p2151_p1 }
 0x1f4   : > { %p2158_p6 = por %p2157_p4, %p2156_p13 }
 0x1f6   : > { %p2159_p8 = pnand %p2158_p6, %p2152_p2 }
 0x1f8   : > { %2162 = shalt.err (!%p2159_p8)
}
 0x1f9   : > { %s2263_s9 = smov 128   ;;  %s2264_s10 = smov 8   ;;  %v1478_v45 = vmul.f32 %v2549_v18, %v2549_v18  ;;  %v1408_v48 = vadd.f32 %v1407_v39, %v2549_v18  ;;  %v1540_v49 = vadd.f32 %v1539_v38, %v1477_v41  ;;  %v1479_v51 = vmul.f32 %v2558_v22, %v2558_v22 }
 0x1fa   : > { %1886 = dma.vmem_to_hbm [thread:$0]  (%p2381_p11), %s2695_s24, 8192, %s2693_s11, %s1585_s18, %s2263_s9, %s2263_s9, %s2264_s10   ;;  %v1480_v55 = vmul.f32 %v2563_v30, %v2563_v30  ;;  %v1481_v60 = vmul.f32 %v2568_v36, %v2568_v36  ;;  %v1482_v18 = vmul.f32 %v2573_v44, %v2573_v44  ;;  %v1494_v41 = vmul.f32 %v2633_v9, %v2633_v9 }
 0x1fb   : > { %v1409_v52 = vadd.f32 %v1408_v48, %v2558_v22  ;;  %v1541_v53 = vadd.f32 %v1540_v49, %v1478_v45  ;;  %v1483_v22 = vmul.f32 %v2578_v50, %v2578_v50  ;;  %v1495_v45 = vmul.f32 %v2638_v16, %v2638_v16  ;;  %s1757_s24 = sshll.u32 %s2437_s27, 3  ;;  %s1590_s21 = scalar_lea.sflag [#allocation9], %s2437_s27 }
 0x1fc   : > { %v1496_v49 = vmul.f32 %v2643_v27, %v2643_v27  ;;  %vm1579_vm0 = vcmask 1040384   ;;  %s239_s11 = scalar_lea.vmem [#allocation8], %s1757_s24  ;;  %vm1581_vm1 = vcmask 1041408   ;;  %s2265_s19 = smov [#allocation8]  }
 0x1fd   : > { %v1410_v57 = vadd.f32 %v1409_v52, %v2563_v30  ;;  %v1542_v59 = vadd.f32 %v1541_v53, %v1479_v51  ;;  %v1484_v30 = vmul.f32 %v2583_v58, %v2583_v58  ;;  %s1619_s18 = sshll.u32 %s239_s11, 4  ;;  %s2167_s25 = sshll.u32 %s2265_s19, 4  ;;  %s2814_s18 = int_to_ptr.vmem [resolvable:$true] %s1619_s18  ;;  %s2168_s25 = int_to_ptr.vmem [resolvable:$false] %s2167_s25 }
 0x1fe   : > { %s2169_s29 = scalar_lea.vmem %s2168_s25, 256  ;;  %p2170_p5 = scmp.lt.s32.totalorder %s2814_s18, %s2168_s25 }
 0x1ff   : > { %v1411_v61 = vadd.f32 %v1410_v57, %v2568_v36  ;;  %v1543_v62 = vadd.f32 %v1542_v59, %v1480_v55  ;;  %v1485_v36 = vmul.f32 %v2588_v0, %v2588_v0 }
 0x201   : > { %v1412_v1 = vadd.f32 %v1411_v61, %v2573_v44  ;;  %v1544_v3 = vadd.f32 %v1543_v62, %v1481_v60  ;;  %v1486_v44 = vmul.f32 %v2593_v8, %v2593_v8 }
 0x203   : > { %v1413_v4 = vadd.f32 %v1412_v1, %v2578_v50  ;;  %v1545_v5 = vadd.f32 %v1544_v3, %v1482_v18  ;;  %v1487_v50 = vmul.f32 %v2598_v14, %v2598_v14  ;;  %v1370_v18 = vld [vmem:[%s2553_s20 + $0x1c8] sm:$0xff]  ;;  %v1502_v1 = vmul.f32 %v2673_v21, %v2673_v21 }
 0x205   : > { %v1414_v6 = vadd.f32 %v1413_v4, %v2583_v58  ;;  %v1546_v7 = vadd.f32 %v1545_v5, %v1483_v22  ;;  %v1488_v58 = vmul.f32 %v2603_v24, %v2603_v24  ;;  %v1371_v22 = vld [vmem:[%s2553_s20 + $0x1d0] sm:$0xff]  ;;  %v1503_v5 = vmul.f32 %v1370_v18, %v1370_v18 }
 0x207   : > { %v1415_v11 = vadd.f32 %v1414_v6, %v2588_v0  ;;  %v1547_v12 = vadd.f32 %v1546_v7, %v1484_v30  ;;  %v1489_v0 = vmul.f32 %v2608_v31, %v2608_v31  ;;  %v1372_v30 = vld [vmem:[%s2553_s20 + $0x1d8] sm:$0xff]  ;;  %v1504_v7 = vmul.f32 %v1371_v22, %v1371_v22 }
 0x209   : > { %v1548_v13 = vadd.f32 %v1547_v12, %v1485_v36  ;;  %v1416_v15 = vadd.f32 %v1415_v11, %v2593_v8  ;;  %v1490_v8 = vmul.f32 %v2613_v40, %v2613_v40  ;;  %v1373_v11 = vld [vmem:[%s2553_s20 + $0x1e0] sm:$0xff]  ;;  %v1505_v12 = vmul.f32 %v1372_v30, %v1372_v30 }
 0x20b   : > { %v1417_v17 = vadd.f32 %v1416_v15, %v2598_v14  ;;  %v1549_v19 = vadd.f32 %v1548_v13, %v1486_v44  ;;  %v1491_v14 = vmul.f32 %v2618_v47, %v2618_v47  ;;  %v1374_v13 = vld [vmem:[%s2553_s20 + $0x1e8] sm:$0xff]  ;;  %v1375_v15 = vld [vmem:[%s2553_s20 + $0x1f0] sm:$0xff] }
 0x20d   : > { %v1418_v20 = vadd.f32 %v1417_v17, %v2603_v24  ;;  %v1550_v23 = vadd.f32 %v1549_v19, %v1487_v50  ;;  %v1492_v24 = vmul.f32 %v2623_v56, %v2623_v56  ;;  %v1506_v17 = vmul.f32 %v1373_v11, %v1373_v11 }
 0x20f   : > { %v1419_v25 = vadd.f32 %v1418_v20, %v2608_v31  ;;  %v1551_v26 = vadd.f32 %v1550_v23, %v1488_v58  ;;  %v1493_v31 = vmul.f32 %v2628_v63, %v2628_v63  ;;  %v1507_v58 = vmul.f32 %v1374_v13, %v1374_v13 }
 0x210   : > { %v1508_v20 = vmul.f32 %v1375_v15, %v1375_v15 }
 0x211   : > { %v1420_v28 = vadd.f32 %v1419_v25, %v2613_v40  ;;  %v1552_v29 = vadd.f32 %v1551_v26, %v1489_v0  ;;  %v1376_v0 = vld [vmem:[%s2553_s20 + $0x1f8] sm:$0xff]  ;;  %s1842_s20 = sshll.u32 %s2245_s15, 7  ;;  %s2163_s15 = scalar_lea.vmem %s2814_s18, 128 }
 0x212   : > { %s2812_s8 = scalar_lea.hbm %s2863_s3, %s1842_s20  ;;  %p2164_p12 = scmp.ne.s32.totalorder %s2814_s18, %s2163_s15 }
 0x213   : > { %v1421_v32 = vadd.f32 %v1420_v28, %v2618_v47  ;;  %v1553_v33 = vadd.f32 %v1552_v29, %v1490_v8  ;;  %v1509_v28 = vmul.f32 %v1376_v0, %v1376_v0  ;;  %p2171_p9 = scmp.lt.s32.totalorder %s2169_s29, %s2163_s15 }
 0x214   : > { %p2165_p10 = pnand %p2164_p12, %p2381_p11 }
 0x215   : > { %v1422_v34 = vadd.f32 %v1421_v32, %v2623_v56  ;;  %v1554_v37 = vadd.f32 %v1553_v33, %v1491_v14  ;;  %p2172_p1 = por %p2171_p9, %p2170_p5 }
 0x216   : > { %p2166_p0 = pneg %p2165_p10 }
 0x217   : > { %v1423_v38 = vadd.f32 %v1422_v34, %v2628_v63  ;;  %v1555_v39 = vadd.f32 %v1554_v37, %v1492_v24 }
 0x218   : > { %p2173_p2 = pnand %p2172_p1, %p2166_p0 }
 0x219   : > { %v1424_v40 = vadd.f32 %v1423_v38, %v2633_v9  ;;  %v1556_v42 = vadd.f32 %v1555_v39, %v1493_v31  ;;  %v1497_v9 = vmul.f32 %v2648_v35, %v2648_v35 }
 0x21b   : > { %v1557_v47 = vadd.f32 %v1556_v42, %v1494_v41  ;;  %v1425_v43 = vadd.f32 %v1424_v40, %v2638_v16  ;;  %v1498_v16 = vmul.f32 %v2653_v46, %v2653_v46 }
 0x21d   : > { %v1558_v56 = vadd.f32 %v1557_v47, %v1495_v45  ;;  %v1426_v48 = vadd.f32 %v1425_v43, %v2643_v27  ;;  %v1499_v27 = vmul.f32 %v2658_v54, %v2658_v54 }
 0x21f   : > { %v1559_v63 = vadd.f32 %v1558_v56, %v1496_v49  ;;  %v1427_v51 = vadd.f32 %v1426_v48, %v2648_v35  ;;  %v1500_v35 = vmul.f32 %v2663_v2, %v2663_v2 }
 0x221   : > { %v1560_v52 = vadd.f32 %v1559_v63, %v1497_v9  ;;  %v1428_v53 = vadd.f32 %v1427_v51, %v2653_v46  ;;  %v1501_v46 = vmul.f32 %v2668_v10, %v2668_v10 }
 0x223   : > { %v1561_v55 = vadd.f32 %v1560_v52, %v1498_v16  ;;  %v1429_v57 = vadd.f32 %v1428_v53, %v2658_v54 }
 0x225   : > { %v1562_v59 = vadd.f32 %v1561_v55, %v1499_v27  ;;  %v1430_v60 = vadd.f32 %v1429_v57, %v2663_v2 }
 0x227   : > { %v1563_v61 = vadd.f32 %v1562_v59, %v1500_v35  ;;  %v1431_v62 = vadd.f32 %v1430_v60, %v2668_v10 }
 0x229   : > { %v1432_v54 = vadd.f32 %v1431_v62, %v2673_v21  ;;  %v1564_v3 = vadd.f32 %v1563_v61, %v1501_v46 }
 0x22b   : > { %v1433_v4 = vadd.f32 %v1432_v54, %v1370_v18  ;;  %v1565_v2 = vadd.f32 %v1564_v3, %v1502_v1 }
 0x22d   : > { %v1434_v6 = vadd.f32 %v1433_v4, %v1371_v22  ;;  %v1566_v36 = vadd.f32 %v1565_v2, %v1503_v5 }
 0x22f   : > { %v1435_v10 = vadd.f32 %v1434_v6, %v1372_v30  ;;  %v1567_v44 = vadd.f32 %v1566_v36, %v1504_v7 }
 0x231   : > { %v1436_v50 = vadd.f32 %v1435_v10, %v1373_v11  ;;  %v1568_v19 = vadd.f32 %v1567_v44, %v1505_v12 }
 0x233   : > { %v1437_v21 = vadd.f32 %v1436_v50, %v1374_v13  ;;  %v1569_v23 = vadd.f32 %v1568_v19, %v1506_v17 }
 0x235   : > { %v1438_v25 = vadd.f32 %v1437_v21, %v1375_v15  ;;  %v1570_v26 = vadd.f32 %v1569_v23, %v1507_v58 }
 0x237   : > { %v1439_v8 = vadd.f32 %v1438_v25, %v1376_v0  ;;  %v1571_v29 = vadd.f32 %v1570_v26, %v1508_v20 }
 0x239   : > { %v1440_v14 = vrot.slane %v1439_v8, 4  ;;  %v1572_v32 = vadd.f32 %v1571_v29, %v1509_v28 }
 0x23b   : > { %v1441_v33 = vadd.f32 %v1440_v14, %v1439_v8  ;;  %v1573_v24 = vrot.slane %v1572_v32, 4 }
 0x23d   : > { %v1442_v34 = vrot.slane %v1441_v33, 2  ;;  %v1574_v37 = vadd.f32 %v1573_v24, %v1572_v32 }
 0x23f   : > { %v1443_v31 = vadd.f32 %v1442_v34, %v1441_v33  ;;  %v1575_v38 = vrot.slane %v1574_v37, 2 }
 0x241   : > { %v1444_v39 = vrot.slane %v1443_v31, 1  ;;  %v1576_v40 = vadd.f32 %v1575_v38, %v1574_v37 }
 0x243   : > { %v1577_v41 = vrot.slane %v1576_v40, 1  ;;  %v1445_v42 = vadd.f32 %v1444_v39, %v1443_v31 }
 0x245   : > { %v1578_v47 = vadd.f32 %v1577_v41, %v1576_v40 }
 0x247   : > { %v1580_v43 = vsel %vm1579_vm0, %v1445_v42, %v1578_v47 }
 0x248   : > { %v1582_v45 = vsel %vm1581_vm1, %v1580_v43, 0.0 }
 0x249   : > { %1583 = vst [vmem:[%s239_s11] sm:$0xff] %v1582_v45 }
 0x24a   : > { %2176 = shalt.err (!%p2173_p2)
}
 0x24b   : > { %s2177_s27 = scalar_lea.hbm %s2812_s8, 128  ;;  %s2181_s22 = scalar_lea.hbm %s2863_s3, 512 }
 0x24c   : > { %p2178_p3 = scmp.ne.s32.totalorder %s2812_s8, %s2177_s27  ;;  %p2182_p4 = scmp.lt.u32.totalorder %s2812_s8, %s2863_s3 }
 0x24d   : > { %p2183_p6 = scmp.lt.u32.totalorder %s2181_s22, %s2177_s27  ;;  %p2185_p12 = scmp.lt.u32.totalorder %s2177_s27, %s2812_s8 }
 0x24e   : > { %p2179_p7 = pnand %p2178_p3, %p2381_p11 }
 0x24f   : > { %p2184_p8 = por %p2183_p6, %p2182_p4 }
 0x250   : > { %p2180_p13 = pneg %p2179_p7 }
 0x251   : > { %p2186_p10 = por %p2185_p12, %p2184_p8 }
 0x253   : > { %p2187_p0 = pnand %p2186_p10, %p2180_p13 }
 0x255   : > { %2190 = shalt.err (!%p2187_p0)
}
 0x256   : > { %1887 = dma.vmem_to_hbm [thread:$0]  (%p2381_p11), %s2814_s18, 128, %s2812_s8, %s1590_s21  }
 0x257 PF: > { %p1908_p5 = scmp.ge.s32.totalorder %s2253_s17, 2  ;;  %s1631_s24 = sand.u32 1, %s2233_s12  }
 0x258   : > { %p2881_p9 = scmp.ne.s32.totalorder %s2871_s23, 0  ;;  %s1632_s20 = scalar_lea.sflag [#allocation4], %s1631_s24 }
 0x25a   : > { %p1899_p1 = pnand %p1908_p5, %p2881_p9 }
 0x25c   : > { %2224 = dma.done.wait (!%p1899_p1), %s1632_s20, 8192  }
 0x25d   : > { %2226 = vsyncadd (!%p1899_p1), %s1632_s20, 4294959104  ;;  %s1641_s11 = scalar_lea.sflag [#allocation9], %s1631_s24 }
 0x25e   : > { %2228 = dma.done.wait (!%p1899_p1), %s1641_s11, 128  }
 0x25f   : > { %2230 = vsyncadd (!%p1899_p1), %s1641_s11, 4294967168  ;;  %s24_s17 = sadd.s32 1, %s2253_s17   ;;  %s2882_s12 = smov %s2237_s13 }
 0x260   : > { %p21_p2 = scmp.ge.s32.totalorder %s24_s17, 6   ;;  %s2883_s13 = smov %s2241_s14 }
 0x261   : > { %s2884_s14 = smov %s2390_s5  ;;  %s2885_s15 = smov %s2249_s16 }
 0x262   : > { %s2886_s16 = smov %s2888_s28  ;;  %23 = sbr.rel (!%p21_p2) target bundleno = 9 (0x9), region = 107 }
 0x269   :  { %1646 = vsyncpa [#allocation3], 1 }
 0x26a   :  { %1648 = vsyncpa [#allocation3 + $0x1], 1 }
 0x26b   :  { %1649 = vsyncpa [#allocation6], 1 }
 0x26c   :  { %1650 = vsyncpa [#allocation4], 1 }
 0x26d   :  { %1652 = vsyncpa [#allocation4 + $0x1], 1 }
 0x26e   :  { %1653 = vsyncpa [#allocation9], 1 }
 0x26f   :  { %1655 = vsyncpa [#allocation9 + $0x1], 1 }

</bundles_post_ra>
